<compile_context>
chip_gen: v5e
topology: v5e:2x2
jax: 0.10.0
libtpu: 0.0.40
codegen_flags: <defaults>
</compile_context>

<pallas_src>
import functools
import math

import jax
import jax.numpy as jnp
from jax import lax
from jax.experimental import pallas as pl
from jax.experimental.pallas import tpu as pltpu

BN_EPS = 1e-5


def _round_up(x, m):
    return ((x + m - 1) // m) * m


# ---------------------------------------------------------------------------
# Single fused kernel: L GMM layers + MLPReadout.
# refs layout (all inputs, then the single output ref):
#   pseudo (E,2) | msrc (E,N) bf16 | mdst (E,N) bf16 | h0 (N,C0) | snorm_scaled (N,1)
#   per layer l: pp_w (2,D) | pp_b (1,D) | gauss_A (2D+1,K) | w_all (C_in, Wpad) bf16
#   readout: w0,b0,w1,b1,w2_pad,b2_pad
#   out: (N, n_classes_padded)
# ---------------------------------------------------------------------------
def monet_fused_kernel(*refs, n_layers, c_outs, residuals, d):
    pseudo_ref, msrc_ref, mdst_ref, h0_ref, snorm_ref = refs[:5]
    layer_refs = refs[5:5 + 4 * n_layers]
    w0_ref, b0_ref, w1_ref, b1_ref, w2_ref, b2_ref = refs[5 + 4 * n_layers:5 + 4 * n_layers + 6]
    o_ref = refs[5 + 4 * n_layers + 6]

    pseudo = pseudo_ref[...]                       # (E, 2) f32
    msrc = msrc_ref[...]                           # (E, N) bf16 one_hot(src)  -- read ONCE
    mdst = mdst_ref[...]                           # (E, N) bf16 one_hot(dst)  -- read ONCE
    snorm = snorm_ref[...]                         # (N, 1) f32 (BN eval scale pre-folded)
    h = h0_ref[...]                                # (N, C0) f32

    for l in range(n_layers):                      # static unroll: per-layer weights differ
        pp_w = layer_refs[4 * l][...]              # (2, D) f32
        pp_b = layer_refs[4 * l + 1][...]          # (1, D) f32
        ga = layer_refs[4 * l + 2][...]            # (2D+1, K) f32
        w_all = layer_refs[4 * l + 3][...]         # (C_in, Wpad) bf16  (concat_k W_k, zero-padded)
        c_out = c_outs[l]
        n_kernels = ga.shape[1]

        # --- fused pseudo_proj: Linear(2, D) + Tanh ---
        p = jnp.tanh(jnp.dot(pseudo, pp_w, preferred_element_type=jnp.float32) + pp_b)   # (E, D)

        # --- all K Gaussian weights at once: exp(p^2 @ A_sq + p @ A_lin + A_const) ---
        logits = (jnp.dot(p * p, ga[0:d, :], preferred_element_type=jnp.float32)
                  + jnp.dot(p, ga[d:2 * d, :], preferred_element_type=jnp.float32)
                  + ga[2 * d:2 * d + 1, :])
        gw = jnp.exp(logits)                                                              # (E, K)

        # --- one gather matmul, then ONE wide projection against concat_k(W_k) ---
        gathered = jnp.dot(msrc, h.astype(jnp.bfloat16),
                           preferred_element_type=jnp.float32)                            # (E, C_in)
        hw = jnp.dot(gathered.astype(jnp.bfloat16), w_all,
                     preferred_element_type=jnp.float32)                                  # (E, Wpad)

        # --- gw-weighted sum over the K column slices (VPU; K is tiny) ---
        msg = gw[:, 0:1] * hw[:, 0:c_out]
        for k in range(1, n_kernels):
            msg = msg + gw[:, k:k + 1] * hw[:, k * c_out:(k + 1) * c_out]                 # (E, C_out)

        # --- scatter: contract E axis of one_hot(dst) (no (N, E) transpose materialized) ---
        agg = lax.dot_general(mdst, msg.astype(jnp.bfloat16),
                              dimension_numbers=(((0,), (0,)), ((), ())),
                              preferred_element_type=jnp.float32)                         # (N, C_out)

        # graph_norm * BatchNorm(eval, identity stats) folded into snorm, then ReLU (+ residual)
        res = jnp.maximum(agg * snorm, 0.0)
        h = (h + res) if residuals[l] else res
        # dropout is identity in eval mode

    # --- fused MLPReadout: Linear+ReLU -> Linear+ReLU -> Linear (lane-dense padded out) ---
    y = jnp.maximum(jnp.dot(h, w0_ref[...], preferred_element_type=jnp.float32) + b0_ref[...], 0.0)
    y = jnp.maximum(jnp.dot(y, w1_ref[...], preferred_element_type=jnp.float32) + b1_ref[...], 0.0)
    y = jnp.dot(y, w2_ref[...], preferred_element_type=jnp.float32) + b2_ref[...]
    o_ref[...] = y.astype(o_ref.dtype)


def _vmem_limit_bytes(arrays, out_bytes):
    in_bytes = sum(int(a.size) * a.dtype.itemsize for a in arrays)
    est = 3 * (in_bytes + out_bytes) + (8 << 20)       # operands + in-kernel edge-space temps
    # Raise the (16/32 MiB) default scoped limit, but stay under v7x's 64 MiB physical VMEM.
    return int(max(16 << 20, min(est, 60 << 20)))


# ---------------------------------------------------------------------------
# MoNet forward: host-side glue (embedding lookup, pseudo coords, one-hot incidence,
# weight repacking / constant folding) + one fused Pallas kernel.
# ---------------------------------------------------------------------------
def monet_forward(params, labels, src, dst, snorm_n):
    n = snorm_n.shape[0]

    # nn.Embedding(in_dim, hidden_dim)
    h0 = params["embedding"][labels]                                        # (N, hidden) f32

    # pseudo[i] = [1/sqrt(in_deg(us[i])+1), 1/sqrt(in_deg(vs[i])+1)]
    in_deg = jnp.bincount(dst, length=n).astype(jnp.float32)
    pseudo = jnp.stack(
        [1.0 / jnp.sqrt(in_deg[src] + 1.0), 1.0 / jnp.sqrt(in_deg[dst] + 1.0)],
        axis=1,
    ).astype(jnp.float32)                                                   # (E, 2)

    # One-hot incidence matrices; 0/1 values are exact in bf16, halves HBM/VMEM traffic.
    # TODO(synk): for large batched graphs replace with scalar-prefetched index gather +
    # sorted-dst segment-sum scatter over an E-tiled grid (dense one-hot is O(E*N)).
    msrc = jax.nn.one_hot(src, n, dtype=jnp.bfloat16)                       # (E, N)
    mdst = jax.nn.one_hot(dst, n, dtype=jnp.bfloat16)                       # (E, N)

    # Fold BatchNorm1d eval scale (identity running stats) into the graph-norm vector.
    # TODO(synk): plumb trained running_mean/var/gamma/beta as per-layer traced (1,C) inputs.
    bn_scale = 1.0 / math.sqrt(1.0 + BN_EPS)
    snorm_scaled = snorm_n.astype(jnp.float32) * bn_scale                   # (N, 1)

    d = params["layers"][0]["mu"].shape[1]
    layer_args, c_outs, residuals = [], [], []
    for layer in params["layers"]:
        kk, c_in, c_out = layer["fc_w"].shape
        mu = layer["mu"]                                                    # (K, D)
        nsig = -0.5 * layer["inv_sigma"] * layer["inv_sigma"]               # (K, D)
        a_sq = nsig.T                                                       # (D, K)
        a_lin = (-2.0 * nsig * mu).T                                        # (D, K)
        a_const = jnp.sum(nsig * mu * mu, axis=1, keepdims=True).T          # (1, K)
        gauss_a = jnp.concatenate([a_sq, a_lin, a_const], axis=0)           # (2D+1, K)

        # concat_k W_k -> (C_in, K*C_out), zero-pad columns to a 128-lane multiple.
        w_all = jnp.transpose(layer["fc_w"], (1, 0, 2)).reshape(c_in, kk * c_out)
        w_pad = _round_up(kk * c_out, 128)
        w_all = jnp.pad(w_all, ((0, 0), (0, w_pad - kk * c_out))).astype(jnp.bfloat16)

        layer_args += [layer["pp_w"], layer["pp_b"].reshape(1, -1), gauss_a, w_all]
        c_outs.append(c_out)
        residuals.append(bool(layer["residual"]) and c_in == c_out)

    # MLPReadout weights; pad the final projection to a lane-dense (128-multiple) width.
    (w0, b0), (w1, b1), (w2, b2) = params["mlp"]
    n_classes = w2.shape[1]
    cls_pad = _round_up(n_classes, 128)
    w2p = jnp.pad(w2, ((0, 0), (0, cls_pad - n_classes)))
    b2p = jnp.pad(b2, (0, cls_pad - n_classes))

    kern = functools.partial(
        monet_fused_kernel,
        n_layers=len(params["layers"]),
        c_outs=tuple(c_outs),
        residuals=tuple(residuals),
        d=d,
    )

    args = (pseudo, msrc, mdst, h0, snorm_scaled, *layer_args,
            w0, b0.reshape(1, -1), w1, b1.reshape(1, -1), w2p, b2p.reshape(1, -1))
    out_bytes = n * cls_pad * 4

    # Single fused invocation: h and msrc/mdst stay VMEM-resident across all layers.
    # TODO(synk): for graphs too large for VMEM, add an E-tiled grid (parallel semantics)
    # with per-N-tile scatter accumulation instead of the single whole-array block.
    out = pl.pallas_call(
        kern,
        out_shape=jax.ShapeDtypeStruct((n, cls_pad), jnp.float32),
        compiler_params=pltpu.CompilerParams(
            vmem_limit_bytes=_vmem_limit_bytes(args, out_bytes)),
    )(*args)
    return out[:, :n_classes]


def init_params(key, in_dim, hidden_dim, out_dim, kernel, dim, n_classes,
                n_layers, residual):
    keys = iter(jax.random.split(key, 64))
    params = {}
    params["embedding"] = 0.1 * jax.random.normal(next(keys), (in_dim, hidden_dim),
                                                  jnp.float32)
    layer_dims = [(hidden_dim, hidden_dim)] * (n_layers - 1) + [(hidden_dim, out_dim)]
    layers = []
    for (cin, cout) in layer_dims:
        layers.append({
            # fc: nn.Linear(cin, kernel*cout, bias=False), stored as (K, cin, cout)
            "fc_w": 0.1 * jax.random.normal(next(keys), (kernel, cin, cout), jnp.float32),
            "mu": 0.1 * jax.random.normal(next(keys), (kernel, dim), jnp.float32),
            "inv_sigma": jnp.ones((kernel, dim), jnp.float32),
            # pseudo_proj: nn.Linear(2, dim)
            "pp_w": 0.5 * jax.random.normal(next(keys), (2, dim), jnp.float32),
            "pp_b": jnp.zeros((dim,), jnp.float32),
            "residual": residual and (cin == cout),
        })
    params["layers"] = layers

    dims = [out_dim, out_dim // 2, out_dim // 4, n_classes]
    mlp = []
    for i in range(3):
        mlp.append((
            0.1 * jax.random.normal(next(keys), (dims[i], dims[i + 1]), jnp.float32),
            jnp.zeros((dims[i + 1],), jnp.float32),
        ))
    params["mlp"] = mlp
    return params


if __name__ == "__main__":
    key = jax.random.PRNGKey(0)
    N, E = 16, 48
    in_dim, hidden_dim, out_dim = 8, 32, 32
    kernel, dim, n_classes, L = 3, 2, 4, 3

    k1, k2, k3, k4 = jax.random.split(key, 4)
    labels = jax.random.randint(k1, (N,), 0, in_dim)          # node label ids -> embedding
    src = jax.random.randint(k2, (E,), 0, N)                  # g.edges() us
    dst = jax.random.randint(k3, (E,), 0, N)                  # g.edges() vs
    snorm_n = jnp.full((N, 1), 1.0 / math.sqrt(N), jnp.float32)

    params = init_params(k4, in_dim, hidden_dim, out_dim, kernel, dim,
                         n_classes, L, residual=True)

    logits = monet_forward(params, labels, src, dst, snorm_n)
    logits = jax.block_until_ready(logits)
    assert logits.shape == (N, n_classes)
    assert bool(jnp.all(jnp.isfinite(logits)))
    # TODO(synk): MoNet.loss (class-weighted cross entropy) not implemented — forward only.
    print("KERNEL_OK")
</pallas_src>

<mosaic_0001>
module attributes {stable_mosaic.version = 11 : i64} {
  func.func @monet_fused_kernel(%arg0: memref<48x2xf32, #tpu.memory_space<vmem>>, %arg1: memref<48x16xbf16, #tpu.memory_space<vmem>>, %arg2: memref<48x16xbf16, #tpu.memory_space<vmem>>, %arg3: memref<16x32xf32, #tpu.memory_space<vmem>>, %arg4: memref<16x1xf32, #tpu.memory_space<vmem>>, %arg5: memref<2x2xf32, #tpu.memory_space<vmem>>, %arg6: memref<1x2xf32, #tpu.memory_space<vmem>>, %arg7: memref<5x3xf32, #tpu.memory_space<vmem>>, %arg8: memref<32x128xbf16, #tpu.memory_space<vmem>>, %arg9: memref<2x2xf32, #tpu.memory_space<vmem>>, %arg10: memref<1x2xf32, #tpu.memory_space<vmem>>, %arg11: memref<5x3xf32, #tpu.memory_space<vmem>>, %arg12: memref<32x128xbf16, #tpu.memory_space<vmem>>, %arg13: memref<2x2xf32, #tpu.memory_space<vmem>>, %arg14: memref<1x2xf32, #tpu.memory_space<vmem>>, %arg15: memref<5x3xf32, #tpu.memory_space<vmem>>, %arg16: memref<32x128xbf16, #tpu.memory_space<vmem>>, %arg17: memref<32x16xf32, #tpu.memory_space<vmem>>, %arg18: memref<1x16xf32, #tpu.memory_space<vmem>>, %arg19: memref<16x8xf32, #tpu.memory_space<vmem>>, %arg20: memref<1x8xf32, #tpu.memory_space<vmem>>, %arg21: memref<8x128xf32, #tpu.memory_space<vmem>>, %arg22: memref<1x128xf32, #tpu.memory_space<vmem>>, %arg23: memref<16x128xf32, #tpu.memory_space<vmem>>) attributes {dimension_semantics = [], scalar_prefetch = 0 : i64, scratch_operands = 0 : i64, tpu.core_type = #tpu.core_type<tc>} {
    %c0 = arith.constant 0 : index
    %c0_0 = arith.constant 0 : index
    %0 = vector.load %arg0[%c0, %c0_0] : memref<48x2xf32, #tpu.memory_space<vmem>>, vector<48x2xf32>
    %c0_1 = arith.constant 0 : index
    %c0_2 = arith.constant 0 : index
    %1 = vector.load %arg1[%c0_1, %c0_2] : memref<48x16xbf16, #tpu.memory_space<vmem>>, vector<48x16xbf16>
    %c0_3 = arith.constant 0 : index
    %c0_4 = arith.constant 0 : index
    %2 = vector.load %arg2[%c0_3, %c0_4] : memref<48x16xbf16, #tpu.memory_space<vmem>>, vector<48x16xbf16>
    %c0_5 = arith.constant 0 : index
    %c0_6 = arith.constant 0 : index
    %3 = vector.load %arg4[%c0_5, %c0_6] : memref<16x1xf32, #tpu.memory_space<vmem>>, vector<16x1xf32>
    %c0_7 = arith.constant 0 : index
    %c0_8 = arith.constant 0 : index
    %4 = vector.load %arg3[%c0_7, %c0_8] : memref<16x32xf32, #tpu.memory_space<vmem>>, vector<16x32xf32>
    %c0_9 = arith.constant 0 : index
    %c0_10 = arith.constant 0 : index
    %5 = vector.load %arg5[%c0_9, %c0_10] : memref<2x2xf32, #tpu.memory_space<vmem>>, vector<2x2xf32>
    %c0_11 = arith.constant 0 : index
    %c0_12 = arith.constant 0 : index
    %6 = vector.load %arg6[%c0_11, %c0_12] : memref<1x2xf32, #tpu.memory_space<vmem>>, vector<1x2xf32>
    %c0_13 = arith.constant 0 : index
    %c0_14 = arith.constant 0 : index
    %7 = vector.load %arg7[%c0_13, %c0_14] : memref<5x3xf32, #tpu.memory_space<vmem>>, vector<5x3xf32>
    %c0_15 = arith.constant 0 : index
    %c0_16 = arith.constant 0 : index
    %8 = vector.load %arg8[%c0_15, %c0_16] : memref<32x128xbf16, #tpu.memory_space<vmem>>, vector<32x128xbf16>
    %cst = arith.constant dense<0.000000e+00> : vector<48x2xf32>
    %9 = tpu.matmul %0, %5, %cst {dimension_numbers = #tpu.dot_dimension_numbers<[1], [0], [0], [1], [0, 0, 1, 1], [], []>} : vector<48x2xf32>, vector<2x2xf32>, vector<48x2xf32> -> vector<48x2xf32>
    %10 = vector.broadcast %6 : vector<1x2xf32> to vector<48x2xf32>
    %11 = arith.addf %9, %10 : vector<48x2xf32>
    %12 = math.tanh %11 : vector<48x2xf32>
    %13 = arith.mulf %12, %12 : vector<48x2xf32>
    %14 = vector.extract_strided_slice %7 {offsets = [0, 0], sizes = [2, 3], strides = [1, 1]} : vector<5x3xf32> to vector<2x3xf32>
    %cst_17 = arith.constant dense<0.000000e+00> : vector<48x3xf32>
    %15 = tpu.matmul %13, %14, %cst_17 {dimension_numbers = #tpu.dot_dimension_numbers<[1], [0], [0], [1], [0, 0, 1, 1], [], []>} : vector<48x2xf32>, vector<2x3xf32>, vector<48x3xf32> -> vector<48x3xf32>
    %16 = vector.extract_strided_slice %7 {offsets = [2, 0], sizes = [2, 3], strides = [1, 1]} : vector<5x3xf32> to vector<2x3xf32>
    %cst_18 = arith.constant dense<0.000000e+00> : vector<48x3xf32>
    %17 = tpu.matmul %12, %16, %cst_18 {dimension_numbers = #tpu.dot_dimension_numbers<[1], [0], [0], [1], [0, 0, 1, 1], [], []>} : vector<48x2xf32>, vector<2x3xf32>, vector<48x3xf32> -> vector<48x3xf32>
    %18 = arith.addf %15, %17 : vector<48x3xf32>
    %19 = vector.extract_strided_slice %7 {offsets = [4, 0], sizes = [1, 3], strides = [1, 1]} : vector<5x3xf32> to vector<1x3xf32>
    %20 = vector.broadcast %19 : vector<1x3xf32> to vector<48x3xf32>
    %21 = arith.addf %18, %20 : vector<48x3xf32>
    %22 = math.exp %21 : vector<48x3xf32>
    %23 = arith.truncf %4 : vector<16x32xf32> to vector<16x32xbf16>
    %cst_19 = arith.constant dense<0.000000e+00> : vector<48x32xf32>
    %24 = tpu.matmul %1, %23, %cst_19 {dimension_numbers = #tpu.dot_dimension_numbers<[1], [0], [0], [1], [0, 0, 1, 1], [], []>} : vector<48x16xbf16>, vector<16x32xbf16>, vector<48x32xf32> -> vector<48x32xf32>
    %25 = arith.truncf %24 : vector<48x32xf32> to vector<48x32xbf16>
    %cst_20 = arith.constant dense<0.000000e+00> : vector<48x128xf32>
    %26 = tpu.matmul %25, %8, %cst_20 {dimension_numbers = #tpu.dot_dimension_numbers<[1], [0], [0], [1], [0, 0, 1, 1], [], []>} : vector<48x32xbf16>, vector<32x128xbf16>, vector<48x128xf32> -> vector<48x128xf32>
    %27 = vector.extract_strided_slice %22 {offsets = [0, 0], sizes = [48, 1], strides = [1, 1]} : vector<48x3xf32> to vector<48x1xf32>
    %28 = vector.extract_strided_slice %26 {offsets = [0, 0], sizes = [48, 32], strides = [1, 1]} : vector<48x128xf32> to vector<48x32xf32>
    %29 = vector.broadcast %27 : vector<48x1xf32> to vector<48x32xf32>
    %30 = arith.mulf %29, %28 : vector<48x32xf32>
    %31 = vector.extract_strided_slice %22 {offsets = [0, 1], sizes = [48, 1], strides = [1, 1]} : vector<48x3xf32> to vector<48x1xf32>
    %32 = vector.extract_strided_slice %26 {offsets = [0, 32], sizes = [48, 32], strides = [1, 1]} : vector<48x128xf32> to vector<48x32xf32>
    %33 = vector.broadcast %31 : vector<48x1xf32> to vector<48x32xf32>
    %34 = arith.mulf %33, %32 : vector<48x32xf32>
    %35 = arith.addf %30, %34 : vector<48x32xf32>
    %36 = vector.extract_strided_slice %22 {offsets = [0, 2], sizes = [48, 1], strides = [1, 1]} : vector<48x3xf32> to vector<48x1xf32>
    %37 = vector.extract_strided_slice %26 {offsets = [0, 64], sizes = [48, 32], strides = [1, 1]} : vector<48x128xf32> to vector<48x32xf32>
    %38 = vector.broadcast %36 : vector<48x1xf32> to vector<48x32xf32>
    %39 = arith.mulf %38, %37 : vector<48x32xf32>
    %40 = arith.addf %35, %39 : vector<48x32xf32>
    %41 = arith.truncf %40 : vector<48x32xf32> to vector<48x32xbf16>
    %cst_21 = arith.constant dense<0.000000e+00> : vector<16x32xf32>
    %42 = tpu.matmul %2, %41, %cst_21 {dimension_numbers = #tpu.dot_dimension_numbers<[0], [0], [1], [1], [0, 1, 1, 1], [], []>} : vector<48x16xbf16>, vector<48x32xbf16>, vector<16x32xf32> -> vector<16x32xf32>
    %43 = vector.broadcast %3 : vector<16x1xf32> to vector<16x32xf32>
    %44 = arith.mulf %42, %43 : vector<16x32xf32>
    %cst_22 = arith.constant 0.000000e+00 : f32
    %45 = vector.broadcast %cst_22 : f32 to vector<16x32xf32>
    %46 = arith.maximumf %44, %45 : vector<16x32xf32>
    %47 = arith.addf %4, %46 : vector<16x32xf32>
    %c0_23 = arith.constant 0 : index
    %c0_24 = arith.constant 0 : index
    %48 = vector.load %arg9[%c0_23, %c0_24] : memref<2x2xf32, #tpu.memory_space<vmem>>, vector<2x2xf32>
    %c0_25 = arith.constant 0 : index
    %c0_26 = arith.constant 0 : index
    %49 = vector.load %arg10[%c0_25, %c0_26] : memref<1x2xf32, #tpu.memory_space<vmem>>, vector<1x2xf32>
    %c0_27 = arith.constant 0 : index
    %c0_28 = arith.constant 0 : index
    %50 = vector.load %arg11[%c0_27, %c0_28] : memref<5x3xf32, #tpu.memory_space<vmem>>, vector<5x3xf32>
    %c0_29 = arith.constant 0 : index
    %c0_30 = arith.constant 0 : index
    %51 = vector.load %arg12[%c0_29, %c0_30] : memref<32x128xbf16, #tpu.memory_space<vmem>>, vector<32x128xbf16>
    %cst_31 = arith.constant dense<0.000000e+00> : vector<48x2xf32>
    %52 = tpu.matmul %0, %48, %cst_31 {dimension_numbers = #tpu.dot_dimension_numbers<[1], [0], [0], [1], [0, 0, 1, 1], [], []>} : vector<48x2xf32>, vector<2x2xf32>, vector<48x2xf32> -> vector<48x2xf32>
    %53 = vector.broadcast %49 : vector<1x2xf32> to vector<48x2xf32>
    %54 = arith.addf %52, %53 : vector<48x2xf32>
    %55 = math.tanh %54 : vector<48x2xf32>
    %56 = arith.mulf %55, %55 : vector<48x2xf32>
    %57 = vector.extract_strided_slice %50 {offsets = [0, 0], sizes = [2, 3], strides = [1, 1]} : vector<5x3xf32> to vector<2x3xf32>
    %cst_32 = arith.constant dense<0.000000e+00> : vector<48x3xf32>
    %58 = tpu.matmul %56, %57, %cst_32 {dimension_numbers = #tpu.dot_dimension_numbers<[1], [0], [0], [1], [0, 0, 1, 1], [], []>} : vector<48x2xf32>, vector<2x3xf32>, vector<48x3xf32> -> vector<48x3xf32>
    %59 = vector.extract_strided_slice %50 {offsets = [2, 0], sizes = [2, 3], strides = [1, 1]} : vector<5x3xf32> to vector<2x3xf32>
    %cst_33 = arith.constant dense<0.000000e+00> : vector<48x3xf32>
    %60 = tpu.matmul %55, %59, %cst_33 {dimension_numbers = #tpu.dot_dimension_numbers<[1], [0], [0], [1], [0, 0, 1, 1], [], []>} : vector<48x2xf32>, vector<2x3xf32>, vector<48x3xf32> -> vector<48x3xf32>
    %61 = arith.addf %58, %60 : vector<48x3xf32>
    %62 = vector.extract_strided_slice %50 {offsets = [4, 0], sizes = [1, 3], strides = [1, 1]} : vector<5x3xf32> to vector<1x3xf32>
    %63 = vector.broadcast %62 : vector<1x3xf32> to vector<48x3xf32>
    %64 = arith.addf %61, %63 : vector<48x3xf32>
    %65 = math.exp %64 : vector<48x3xf32>
    %66 = arith.truncf %47 : vector<16x32xf32> to vector<16x32xbf16>
    %cst_34 = arith.constant dense<0.000000e+00> : vector<48x32xf32>
    %67 = tpu.matmul %1, %66, %cst_34 {dimension_numbers = #tpu.dot_dimension_numbers<[1], [0], [0], [1], [0, 0, 1, 1], [], []>} : vector<48x16xbf16>, vector<16x32xbf16>, vector<48x32xf32> -> vector<48x32xf32>
    %68 = arith.truncf %67 : vector<48x32xf32> to vector<48x32xbf16>
    %cst_35 = arith.constant dense<0.000000e+00> : vector<48x128xf32>
    %69 = tpu.matmul %68, %51, %cst_35 {dimension_numbers = #tpu.dot_dimension_numbers<[1], [0], [0], [1], [0, 0, 1, 1], [], []>} : vector<48x32xbf16>, vector<32x128xbf16>, vector<48x128xf32> -> vector<48x128xf32>
    %70 = vector.extract_strided_slice %65 {offsets = [0, 0], sizes = [48, 1], strides = [1, 1]} : vector<48x3xf32> to vector<48x1xf32>
    %71 = vector.extract_strided_slice %69 {offsets = [0, 0], sizes = [48, 32], strides = [1, 1]} : vector<48x128xf32> to vector<48x32xf32>
    %72 = vector.broadcast %70 : vector<48x1xf32> to vector<48x32xf32>
    %73 = arith.mulf %72, %71 : vector<48x32xf32>
    %74 = vector.extract_strided_slice %65 {offsets = [0, 1], sizes = [48, 1], strides = [1, 1]} : vector<48x3xf32> to vector<48x1xf32>
    %75 = vector.extract_strided_slice %69 {offsets = [0, 32], sizes = [48, 32], strides = [1, 1]} : vector<48x128xf32> to vector<48x32xf32>
    %76 = vector.broadcast %74 : vector<48x1xf32> to vector<48x32xf32>
    %77 = arith.mulf %76, %75 : vector<48x32xf32>
    %78 = arith.addf %73, %77 : vector<48x32xf32>
    %79 = vector.extract_strided_slice %65 {offsets = [0, 2], sizes = [48, 1], strides = [1, 1]} : vector<48x3xf32> to vector<48x1xf32>
    %80 = vector.extract_strided_slice %69 {offsets = [0, 64], sizes = [48, 32], strides = [1, 1]} : vector<48x128xf32> to vector<48x32xf32>
    %81 = vector.broadcast %79 : vector<48x1xf32> to vector<48x32xf32>
    %82 = arith.mulf %81, %80 : vector<48x32xf32>
    %83 = arith.addf %78, %82 : vector<48x32xf32>
    %84 = arith.truncf %83 : vector<48x32xf32> to vector<48x32xbf16>
    %cst_36 = arith.constant dense<0.000000e+00> : vector<16x32xf32>
    %85 = tpu.matmul %2, %84, %cst_36 {dimension_numbers = #tpu.dot_dimension_numbers<[0], [0], [1], [1], [0, 1, 1, 1], [], []>} : vector<48x16xbf16>, vector<48x32xbf16>, vector<16x32xf32> -> vector<16x32xf32>
    %86 = vector.broadcast %3 : vector<16x1xf32> to vector<16x32xf32>
    %87 = arith.mulf %85, %86 : vector<16x32xf32>
    %cst_37 = arith.constant 0.000000e+00 : f32
    %88 = vector.broadcast %cst_37 : f32 to vector<16x32xf32>
    %89 = arith.maximumf %87, %88 : vector<16x32xf32>
    %90 = arith.addf %47, %89 : vector<16x32xf32>
    %c0_38 = arith.constant 0 : index
    %c0_39 = arith.constant 0 : index
    %91 = vector.load %arg13[%c0_38, %c0_39] : memref<2x2xf32, #tpu.memory_space<vmem>>, vector<2x2xf32>
    %c0_40 = arith.constant 0 : index
    %c0_41 = arith.constant 0 : index
    %92 = vector.load %arg14[%c0_40, %c0_41] : memref<1x2xf32, #tpu.memory_space<vmem>>, vector<1x2xf32>
    %c0_42 = arith.constant 0 : index
    %c0_43 = arith.constant 0 : index
    %93 = vector.load %arg15[%c0_42, %c0_43] : memref<5x3xf32, #tpu.memory_space<vmem>>, vector<5x3xf32>
    %c0_44 = arith.constant 0 : index
    %c0_45 = arith.constant 0 : index
    %94 = vector.load %arg16[%c0_44, %c0_45] : memref<32x128xbf16, #tpu.memory_space<vmem>>, vector<32x128xbf16>
    %cst_46 = arith.constant dense<0.000000e+00> : vector<48x2xf32>
    %95 = tpu.matmul %0, %91, %cst_46 {dimension_numbers = #tpu.dot_dimension_numbers<[1], [0], [0], [1], [0, 0, 1, 1], [], []>} : vector<48x2xf32>, vector<2x2xf32>, vector<48x2xf32> -> vector<48x2xf32>
    %96 = vector.broadcast %92 : vector<1x2xf32> to vector<48x2xf32>
    %97 = arith.addf %95, %96 : vector<48x2xf32>
    %98 = math.tanh %97 : vector<48x2xf32>
    %99 = arith.mulf %98, %98 : vector<48x2xf32>
    %100 = vector.extract_strided_slice %93 {offsets = [0, 0], sizes = [2, 3], strides = [1, 1]} : vector<5x3xf32> to vector<2x3xf32>
    %cst_47 = arith.constant dense<0.000000e+00> : vector<48x3xf32>
    %101 = tpu.matmul %99, %100, %cst_47 {dimension_numbers = #tpu.dot_dimension_numbers<[1], [0], [0], [1], [0, 0, 1, 1], [], []>} : vector<48x2xf32>, vector<2x3xf32>, vector<48x3xf32> -> vector<48x3xf32>
    %102 = vector.extract_strided_slice %93 {offsets = [2, 0], sizes = [2, 3], strides = [1, 1]} : vector<5x3xf32> to vector<2x3xf32>
    %cst_48 = arith.constant dense<0.000000e+00> : vector<48x3xf32>
    %103 = tpu.matmul %98, %102, %cst_48 {dimension_numbers = #tpu.dot_dimension_numbers<[1], [0], [0], [1], [0, 0, 1, 1], [], []>} : vector<48x2xf32>, vector<2x3xf32>, vector<48x3xf32> -> vector<48x3xf32>
    %104 = arith.addf %101, %103 : vector<48x3xf32>
    %105 = vector.extract_strided_slice %93 {offsets = [4, 0], sizes = [1, 3], strides = [1, 1]} : vector<5x3xf32> to vector<1x3xf32>
    %106 = vector.broadcast %105 : vector<1x3xf32> to vector<48x3xf32>
    %107 = arith.addf %104, %106 : vector<48x3xf32>
    %108 = math.exp %107 : vector<48x3xf32>
    %109 = arith.truncf %90 : vector<16x32xf32> to vector<16x32xbf16>
    %cst_49 = arith.constant dense<0.000000e+00> : vector<48x32xf32>
    %110 = tpu.matmul %1, %109, %cst_49 {dimension_numbers = #tpu.dot_dimension_numbers<[1], [0], [0], [1], [0, 0, 1, 1], [], []>} : vector<48x16xbf16>, vector<16x32xbf16>, vector<48x32xf32> -> vector<48x32xf32>
    %111 = arith.truncf %110 : vector<48x32xf32> to vector<48x32xbf16>
    %cst_50 = arith.constant dense<0.000000e+00> : vector<48x128xf32>
    %112 = tpu.matmul %111, %94, %cst_50 {dimension_numbers = #tpu.dot_dimension_numbers<[1], [0], [0], [1], [0, 0, 1, 1], [], []>} : vector<48x32xbf16>, vector<32x128xbf16>, vector<48x128xf32> -> vector<48x128xf32>
    %113 = vector.extract_strided_slice %108 {offsets = [0, 0], sizes = [48, 1], strides = [1, 1]} : vector<48x3xf32> to vector<48x1xf32>
    %114 = vector.extract_strided_slice %112 {offsets = [0, 0], sizes = [48, 32], strides = [1, 1]} : vector<48x128xf32> to vector<48x32xf32>
    %115 = vector.broadcast %113 : vector<48x1xf32> to vector<48x32xf32>
    %116 = arith.mulf %115, %114 : vector<48x32xf32>
    %117 = vector.extract_strided_slice %108 {offsets = [0, 1], sizes = [48, 1], strides = [1, 1]} : vector<48x3xf32> to vector<48x1xf32>
    %118 = vector.extract_strided_slice %112 {offsets = [0, 32], sizes = [48, 32], strides = [1, 1]} : vector<48x128xf32> to vector<48x32xf32>
    %119 = vector.broadcast %117 : vector<48x1xf32> to vector<48x32xf32>
    %120 = arith.mulf %119, %118 : vector<48x32xf32>
    %121 = arith.addf %116, %120 : vector<48x32xf32>
    %122 = vector.extract_strided_slice %108 {offsets = [0, 2], sizes = [48, 1], strides = [1, 1]} : vector<48x3xf32> to vector<48x1xf32>
    %123 = vector.extract_strided_slice %112 {offsets = [0, 64], sizes = [48, 32], strides = [1, 1]} : vector<48x128xf32> to vector<48x32xf32>
    %124 = vector.broadcast %122 : vector<48x1xf32> to vector<48x32xf32>
    %125 = arith.mulf %124, %123 : vector<48x32xf32>
    %126 = arith.addf %121, %125 : vector<48x32xf32>
    %127 = arith.truncf %126 : vector<48x32xf32> to vector<48x32xbf16>
    %cst_51 = arith.constant dense<0.000000e+00> : vector<16x32xf32>
    %128 = tpu.matmul %2, %127, %cst_51 {dimension_numbers = #tpu.dot_dimension_numbers<[0], [0], [1], [1], [0, 1, 1, 1], [], []>} : vector<48x16xbf16>, vector<48x32xbf16>, vector<16x32xf32> -> vector<16x32xf32>
    %129 = vector.broadcast %3 : vector<16x1xf32> to vector<16x32xf32>
    %130 = arith.mulf %128, %129 : vector<16x32xf32>
    %cst_52 = arith.constant 0.000000e+00 : f32
    %131 = vector.broadcast %cst_52 : f32 to vector<16x32xf32>
    %132 = arith.maximumf %130, %131 : vector<16x32xf32>
    %133 = arith.addf %90, %132 : vector<16x32xf32>
    %c0_53 = arith.constant 0 : index
    %c0_54 = arith.constant 0 : index
    %134 = vector.load %arg17[%c0_53, %c0_54] : memref<32x16xf32, #tpu.memory_space<vmem>>, vector<32x16xf32>
    %cst_55 = arith.constant dense<0.000000e+00> : vector<16x16xf32>
    %135 = tpu.matmul %133, %134, %cst_55 {dimension_numbers = #tpu.dot_dimension_numbers<[1], [0], [0], [1], [0, 0, 1, 1], [], []>} : vector<16x32xf32>, vector<32x16xf32>, vector<16x16xf32> -> vector<16x16xf32>
    %c0_56 = arith.constant 0 : index
    %c0_57 = arith.constant 0 : index
    %136 = vector.load %arg18[%c0_56, %c0_57] : memref<1x16xf32, #tpu.memory_space<vmem>>, vector<1x16xf32>
    %137 = vector.broadcast %136 : vector<1x16xf32> to vector<16x16xf32>
    %138 = arith.addf %135, %137 : vector<16x16xf32>
    %cst_58 = arith.constant 0.000000e+00 : f32
    %139 = vector.broadcast %cst_58 : f32 to vector<16x16xf32>
    %140 = arith.maximumf %138, %139 : vector<16x16xf32>
    %c0_59 = arith.constant 0 : index
    %c0_60 = arith.constant 0 : index
    %141 = vector.load %arg19[%c0_59, %c0_60] : memref<16x8xf32, #tpu.memory_space<vmem>>, vector<16x8xf32>
    %cst_61 = arith.constant dense<0.000000e+00> : vector<16x8xf32>
    %142 = tpu.matmul %140, %141, %cst_61 {dimension_numbers = #tpu.dot_dimension_numbers<[1], [0], [0], [1], [0, 0, 1, 1], [], []>} : vector<16x16xf32>, vector<16x8xf32>, vector<16x8xf32> -> vector<16x8xf32>
    %c0_62 = arith.constant 0 : index
    %c0_63 = arith.constant 0 : index
    %143 = vector.load %arg20[%c0_62, %c0_63] : memref<1x8xf32, #tpu.memory_space<vmem>>, vector<1x8xf32>
    %144 = vector.broadcast %143 : vector<1x8xf32> to vector<16x8xf32>
    %145 = arith.addf %142, %144 : vector<16x8xf32>
    %cst_64 = arith.constant 0.000000e+00 : f32
    %146 = vector.broadcast %cst_64 : f32 to vector<16x8xf32>
    %147 = arith.maximumf %145, %146 : vector<16x8xf32>
    %c0_65 = arith.constant 0 : index
    %c0_66 = arith.constant 0 : index
    %148 = vector.load %arg21[%c0_65, %c0_66] : memref<8x128xf32, #tpu.memory_space<vmem>>, vector<8x128xf32>
    %cst_67 = arith.constant dense<0.000000e+00> : vector<16x128xf32>
    %149 = tpu.matmul %147, %148, %cst_67 {dimension_numbers = #tpu.dot_dimension_numbers<[1], [0], [0], [1], [0, 0, 1, 1], [], []>} : vector<16x8xf32>, vector<8x128xf32>, vector<16x128xf32> -> vector<16x128xf32>
    %c0_68 = arith.constant 0 : index
    %c0_69 = arith.constant 0 : index
    %150 = vector.load %arg22[%c0_68, %c0_69] : memref<1x128xf32, #tpu.memory_space<vmem>>, vector<1x128xf32>
    %151 = vector.broadcast %150 : vector<1x128xf32> to vector<16x128xf32>
    %152 = arith.addf %149, %151 : vector<16x128xf32>
    %c0_70 = arith.constant 0 : index
    %c0_71 = arith.constant 0 : index
    %153 = vector.load %arg23[%c0_70, %c0_71] : memref<16x128xf32, #tpu.memory_space<vmem>>, vector<16x128xf32>
    tpu.vector_store %arg23[%c0_70, %c0_71], %152 {strides = array<i32>} : memref<16x128xf32, #tpu.memory_space<vmem>>, vector<16x128xf32>,
    return
  }
}

</mosaic_0001>

<bundles_post_ra>
// kernel: tpu_custom_call.1
= control target key start
LH: loop header
LB: loop body
LE: loop exit
PB: predicated region body
PF: predicated region fallthrough
CT: control target
= control target key end

     0   :  { %s2530_s0 = inlined_call_operand.vmem [shape: f32[48,2], index: 0, kind: input, shape index: {}]   ;;  %s2531_s1 = inlined_call_operand.vmem [shape: bf16[48,16], index: 1, kind: input, shape index: {}]   ;;  %s2532_s2 = inlined_call_operand.vmem [shape: bf16[48,16], index: 2, kind: input, shape index: {}]   ;;  %s2533_s3 = inlined_call_operand.vmem [shape: f32[16,32], index: 3, kind: input, shape index: {}]   ;;  %s2534_s4 = inlined_call_operand.vmem [shape: f32[16,1], index: 4, kind: input, shape index: {}]   ;;  %s2535_s5 = inlined_call_operand.vmem [shape: f32[2,2], index: 5, kind: input, shape index: {}]   ;;  %s2536_s6 = inlined_call_operand.vmem [shape: f32[1,2], index: 6, kind: input, shape index: {}]   ;;  %s2537_s7 = inlined_call_operand.vmem [shape: f32[5,3], index: 7, kind: input, shape index: {}]   ;;  %s2538_s8 = inlined_call_operand.vmem [shape: bf16[32,128], index: 8, kind: input, shape index: {}]   ;;  %s2539_s9 = inlined_call_operand.vmem [shape: f32[2,2], index: 9, kind: input, shape index: {}]   ;;  %s2540_s10 = inlined_call_operand.vmem [shape: f32[1,2], index: 10, kind: input, shape index: {}]   ;;  %s2541_s11 = inlined_call_operand.vmem [shape: f32[5,3], index: 11, kind: input, shape index: {}]   ;;  %s2542_s12 = inlined_call_operand.vmem [shape: bf16[32,128], index: 12, kind: input, shape index: {}]   ;;  %s2543_s13 = inlined_call_operand.vmem [shape: f32[2,2], index: 13, kind: input, shape index: {}]   ;;  %s2544_s14 = inlined_call_operand.vmem [shape: f32[1,2], index: 14, kind: input, shape index: {}]   ;;  %s2545_s15 = inlined_call_operand.vmem [shape: f32[5,3], index: 15, kind: input, shape index: {}]   ;;  %s2546_s16 = inlined_call_operand.vmem [shape: bf16[32,128], index: 16, kind: input, shape index: {}]   ;;  %s2547_s17 = inlined_call_operand.vmem [shape: f32[32,16], index: 17, kind: input, shape index: {}]   ;;  %s2548_s18 = inlined_call_operand.vmem [shape: f32[1,16], index: 18, kind: input, shape index: {}]   ;;  %s2549_s19 = inlined_call_operand.vmem [shape: f32[16,8], index: 19, kind: input, shape index: {}]   ;;  %s2550_s20 = inlined_call_operand.vmem [shape: f32[1,8], index: 20, kind: input, shape index: {}]   ;;  %s2551_s21 = inlined_call_operand.vmem [shape: f32[8,128], index: 21, kind: input, shape index: {}]   ;;  %s2552_s22 = inlined_call_operand.vmem [shape: f32[1,128], index: 22, kind: input, shape index: {}]   ;;  %s2553_s23 = inlined_call_operand.hbm [shape: f32[16,128], index: 23, kind: output, shape index: {}]  }
   0x1   :  { %2559 = sst [smem:[#allocation5_spill]] %s2530_s0 }
   0x2   :  { %2560 = sst [smem:[#allocation6_spill]] %s2531_s1 }
   0x3   :  { %2561 = sst [smem:[#allocation7_spill]] %s2532_s2 }
   0x4   :  { %2562 = sst [smem:[#allocation8_spill]] %s2533_s3 }
   0x5   :  { %2563 = sst [smem:[#allocation9_spill]] %s2534_s4 }
   0x6   :  { %2564 = sst [smem:[#allocation10_spill]] %s2535_s5 }
   0x7   :  { %2565 = sst [smem:[#allocation11_spill]] %s2536_s6 }
   0x8   :  { %2566 = sst [smem:[#allocation12_spill]] %s2537_s7 }
   0x9   :  { %s2567_s24 = sld [smem:[#allocation10_spill]]  ;;  %vm127_vm0 = vcmask 1041408   ;;  %vm108_vm1 = vcmask 15360  }
   0xa   :  { %s2568_s1 = sld [smem:[#allocation5_spill]] }
   0xf   :  { %v98_v0 = vld [vmem:[%s2567_s24] sm:$0x3] }
  0x10   :  { %v2095_v1 = vld [vmem:[%s2568_s1] sm:$0xff]  ;;  %1652 = vmatpush.msk.msra.mxu0 %vm127_vm0, %v98_v0 }
  0x11   :  { %1653 = vmatmul.msk.f32.vlgmr.msra.gmra.mxu0 %vm108_vm1, %v2095_v1 }
  0x12   :  { %28 = vsyncpa [#allocation3], 0  ;;  %v2103_v2 = vld [vmem:[%s2568_s1 + $0x8] sm:$0xff]  ;;  %s2569_s7 = sld [smem:[#allocation8_spill]]  ;;  %vm325_vm2 = vcmask 130048   ;;  %v2127_v7 = vld [vmem:[%s2568_s1 + $0x10] sm:$0xff] }
  0x13   :  { %s2570_s4 = sld [smem:[#allocation6_spill]]  ;;  %v2136_v8 = vld [vmem:[%s2568_s1 + $0x18] sm:$0xff]  ;;  %v2148_v10 = vld [vmem:[%s2568_s1 + $0x20] sm:$0xff]  ;;  %v2157_v11 = vld [vmem:[%s2568_s1 + $0x28] sm:$0xff]  ;;  %vm374_vm3 = vcmask 261120   ;;  %v1961_v51 = vmov 1  }
  0x14   :  { %s2571_s0 = sld [smem:[#allocation12_spill]]  ;;  %v1797_v27 = vld [vmem:[%s2538_s8 + $0x8] sm:$0xff]  ;;  %v1796_v28 = vld [vmem:[%s2538_s8] sm:$0xff]  ;;  %1812 = vset.pattern.permute.xlu2 %v1961_v51  ;;  %1814 = vset.pattern.permute.xlu1 %v1961_v51  ;;  %v1962_v52 = vmov 2   ;;  %s1964_s8 = smov 96   ;;  %vm601_vm4 = vcmask 392192  }
  0x15   :  { %s2572_s5 = sld [smem:[#allocation11_spill]]  ;;  %390 = vmatpush.bf16.msrb.mxu0 %v1797_v27  ;;  %1816 = vset.pattern.permute.xlu0 %v1962_v52  ;;  %vm1602_vm5 = vcmask 64512   ;;  %s1640_s28 = sshll.u32 %s2553_s23, 4  ;;  %s1641_s28 = int_to_ptr.hbm [resolvable:$true] %s1640_s28 }
  0x16   :  { %s2573_s3 = sld [smem:[#allocation9_spill]] }
  0x17   :  { %s2574_s25 = sld [smem:[#allocation7_spill]] }
  0x18   :  { %v2110_v3 = vld [vmem:[%s2569_s7] sm:$0xff]  ;;  %v2115_v4 = vld [vmem:[%s2569_s7 + $0x8] sm:$0xff]  ;;  %s1965_s7 = smov 64  }
  0x19   :  { %1654 = vmatmul.msk.f32.gmra.mxu0 %vm108_vm1, %v2103_v2  ;;  %v309_v5 = vpack.c.bf16 %v2115_v4, %v2110_v3  ;;  %v2122_v6 = vld [vmem:[%s2570_s4] sm:$0xff]  ;;  %v2143_v9 = vld [vmem:[%s2570_s4 + $0x8] sm:$0xff]  ;;  %v2173_v14 = vld [vmem:[%s2570_s4 + $0x10] sm:$0xff] }
  0x1a   :  { %v2164_v12 = vld [vmem:[%s2571_s0] sm:$0x1f]  ;;  %391 = vmatpush.bf16.msrb.mxu0 %v1796_v28 }
  0x1b   :  { %342 = vmatpush.bf16.msra.mxu3 %v309_v5  ;;  %v179_v13 = vrot.slane %v2164_v12, 2  ;;  %1666 = vmatpush.msk.msra.mxu2 %vm127_vm0, %v2164_v12  ;;  %v1854_v15 = vld [vmem:[%s2572_s5] ss:$0 sm:$0xff]  ;;  %v290_v54 = vperm.slane %v2164_v12, 4 }
  0x1d   :  { %1659 = vmatpush.msk.msra.mxu1 %vm127_vm0, %v179_v13 }
  0x1e   :  { %1685 = vmatmul.msk.bf16.vlgmr.msra.gmra.mxu3 %vm325_vm2, %v2122_v6 }
  0x21   :  { %1655 = vmatmul.msk.f32.gmra.mxu0 %vm108_vm1, %v2127_v7 }
  0x29   :  { %1656 = vmatmul.msk.f32.gmra.mxu0 %vm108_vm1, %v2136_v8 }
  0x2e   :  { %1686 = vmatmul.msk.bf16.gmra.mxu3 %vm325_vm2, %v2143_v9 }
  0x31   :  { %1657 = vmatmul.msk.f32.gmra.mxu0 %vm108_vm1, %v2148_v10 }
  0x39   :  { %1658 = vmatmul.msk.f32.gmra.mxu0 %vm108_vm1, %v2157_v11 }
  0x3e   :  { %1687 = vmatmul.msk.bf16.gmra.mxu3 %vm325_vm2, %v2173_v14 }
  0x8e   :  { %v148_v16 = vpop.f32.mrf.mxu0 }
  0x8f   :  { %v149_v17 = vadd.f32 %v1854_v15, %v148_v16 }
  0x91   :  { %1860 = vtanh.f32 %v149_v17 }
  0x96   :  { %v151_v18 = vpop.f32.mrf.mxu0 }
  0x97   :  { %v1861_v19 = vpop.eup %1860  ;;  %v152_v20 = vadd.f32 %v1854_v15, %v151_v18 }
  0x98   :  { %1660 = vmatmul.msk.f32.vlgmr.msra.gmra.mxu1 %vm108_vm1, %v1861_v19  ;;  %v172_v21 = vmul.f32 %v1861_v19, %v1861_v19 }
  0x99   :  { %1862 = vtanh.f32 %v152_v20 }
  0x9a   :  { %1667 = vmatmul.msk.f32.vlgmr.msra.gmra.mxu2 %vm108_vm1, %v172_v21 }
  0x9e   :  { %v154_v22 = vpop.f32.mrf.mxu0 }
  0x9f   :  { %v1863_v23 = vpop.eup %1862  ;;  %v155_v24 = vadd.f32 %v1854_v15, %v154_v22 }
  0xa0   :  { %1661 = vmatmul.msk.f32.gmra.mxu1 %vm108_vm1, %v1863_v23  ;;  %v173_v25 = vmul.f32 %v1863_v23, %v1863_v23 }
  0xa1   :  { %1864 = vtanh.f32 %v155_v24  ;;  %v344_v26 = vpop.f32.mrf.mxu3 }
  0xa2   :  { %1668 = vmatmul.msk.f32.gmra.mxu2 %vm108_vm1, %v173_v25 }
  0xa6   :  { %v157_v29 = vpop.f32.mrf.mxu0 }
  0xa7   :  { %v1865_v30 = vpop.eup %1864  ;;  %v158_v31 = vadd.f32 %v1854_v15, %v157_v29 }
  0xa8   :  { %1662 = vmatmul.msk.f32.gmra.mxu1 %vm108_vm1, %v1865_v30  ;;  %v174_v32 = vmul.f32 %v1865_v30, %v1865_v30 }
  0xa9   :  { %1866 = vtanh.f32 %v158_v31  ;;  %v346_v33 = vpop.f32.mrf.mxu3 }
  0xaa   :  { %1669 = vmatmul.msk.f32.gmra.mxu2 %vm108_vm1, %v174_v32  ;;  %v359_v34 = vpack.c.bf16 %v346_v33, %v344_v26 }
  0xac   :  { %1696 = vmatmul.msk.bf16.vlgmr.msrb.gmra.mxu0 %vm374_vm3, %v359_v34 }
  0xae   :  { %v160_v35 = vpop.f32.mrf.mxu0 }
  0xaf   :  { %v1867_v36 = vpop.eup %1866  ;;  %v161_v37 = vadd.f32 %v1854_v15, %v160_v35 }
  0xb0   :  { %1663 = vmatmul.msk.f32.gmra.mxu1 %vm108_vm1, %v1867_v36  ;;  %v175_v38 = vmul.f32 %v1867_v36, %v1867_v36  ;;  %v1963_v36 = vmov 0  }
  0xb1   :  { %1868 = vtanh.f32 %v161_v37  ;;  %v349_v45 = vpop.f32.mrf.mxu3 }
  0xb2   :  { %1670 = vmatmul.msk.f32.gmra.mxu2 %vm108_vm1, %v175_v38 }
  0xb6   :  { %v163_v39 = vpop.f32.mrf.mxu0 }
  0xb7   :  { %v1869_v40 = vpop.eup %1868  ;;  %v164_v41 = vadd.f32 %v1854_v15, %v163_v39 }
  0xb8   :  { %1664 = vmatmul.msk.f32.gmra.mxu1 %vm108_vm1, %v1869_v40  ;;  %v176_v42 = vmul.f32 %v1869_v40, %v1869_v40 }
  0xb9   :  { %1870 = vtanh.f32 %v164_v41  ;;  %v351_v46 = vpop.f32.mrf.mxu3 }
  0xba   :  { %1671 = vmatmul.msk.f32.gmra.mxu2 %vm108_vm1, %v176_v42  ;;  %v360_v47 = vpack.c.bf16 %v351_v46, %v349_v45 }
  0xbc   :  { %1697 = vmatmul.msk.bf16.gmra.mxu0 %vm374_vm3, %v360_v47 }
  0xbf   :  { %v1871_v43 = vpop.eup %1870 }
  0xc0   :  { %1665 = vmatmul.msk.f32.gmra.mxu1 %vm108_vm1, %v1871_v43  ;;  %v177_v44 = vmul.f32 %v1871_v43, %v1871_v43 }
  0xc1   :  { %v354_v48 = vpop.f32.mrf.mxu3 }
  0xc2   :  { %1672 = vmatmul.msk.f32.gmra.mxu2 %vm108_vm1, %v177_v44 }
  0xc9   :  { %v356_v49 = vpop.f32.mrf.mxu3 }
  0xca   :  { %v361_v50 = vpack.c.bf16 %v356_v49, %v354_v48 }
  0xcc   :  { %1698 = vmatmul.msk.bf16.gmra.mxu0 %vm374_vm3, %v361_v50 }
 0x115   :  { %v217_v53 = vpop.f32.mrf.mxu1 }
 0x11d   :  { %v220_v55 = vpop.f32.mrf.mxu1  ;;  %v272_v56 = vpop.f32.mrf.mxu2 }
 0x11e   :  { %v273_v57 = vadd.f32 %v272_v56, %v217_v53 }
 0x120   :  { %v291_v58 = vadd.f32 %v290_v54, %v273_v57 }
 0x122   :  { %v297_v59 = vmul.f32 1.442695, %v291_v58 }
 0x124   :  { %1872 = vpow2.f32 %v297_v59 }
 0x125   :  { %v275_v60 = vpop.f32.mrf.mxu2  ;;  %v223_v62 = vpop.f32.mrf.mxu1 }
 0x126   :  { %v276_v61 = vadd.f32 %v275_v60, %v220_v55 }
 0x128   :  { %v292_v63 = vadd.f32 %v290_v54, %v276_v61 }
 0x129   :  { %v2213_v38 = vpop.f32.mrf.mxu0 }
 0x12a   :  { %v1873_v0 = vpop.eup %1872  ;;  %v299_v5 = vmul.f32 1.442695, %v292_v63 }
 0x12b   :  { %445 = vperm.xlu2 %1812, %v1873_v0  }
 0x12c   :  { %1874 = vpow2.f32 %v299_v5 }
 0x12d   :  { %v278_v13 = vpop.f32.mrf.mxu2  ;;  %v226_v17 = vpop.f32.mrf.mxu1 }
 0x12e   :  { %v279_v15 = vadd.f32 %v278_v13, %v223_v62 }
 0x130   :  { %v293_v16 = vadd.f32 %v290_v54, %v279_v15 }
 0x131   :  { %v2215_v40 = vpop.f32.mrf.mxu0 }
 0x132   :  { %v1875_v18 = vpop.eup %1874  ;;  %v301_v12 = vmul.f32 1.442695, %v293_v16 }
 0x133   :  { %449 = vperm.xlu1 %1814, %v1875_v18   ;;  %1813 = vset.pattern.permute.xlu2 %v1962_v52 }
 0x134   :  { %1876 = vpow2.f32 %v301_v12  ;;  %505 = vperm.xlu2 %1813, %v1873_v0   ;;  %v95_v12 = vld [vmem:[%s2573_s3 + $0x8] sm:$0xff] }
 0x135   :  { %v281_v19 = vpop.f32.mrf.mxu2  ;;  %v229_v24 = vpop.f32.mrf.mxu1 }
 0x136   :  { %v282_v20 = vadd.f32 %v281_v19, %v226_v17  ;;  %v94_v17 = vld [vmem:[%s2573_s3] sm:$0xff] }
 0x137   :  { %v1793_v19 = vld [vmem:[%s2574_s25] sm:$0xff] }
 0x138   :  { %v294_v21 = vadd.f32 %v290_v54, %v282_v20  ;;  %v1794_v20 = vld [vmem:[%s2574_s25 + $0x8] sm:$0xff] }
 0x139   :  { %v2217_v42 = vpop.f32.mrf.mxu0 }
 0x13a   :  { %v1877_v22 = vpop.eup %1876  ;;  %v303_v23 = vmul.f32 1.442695, %v294_v21 }
 0x13b   :  { %513 = vperm.xlu0 %1816, %v1877_v22   ;;  %1817 = vset.pattern.permute.xlu1 %v1962_v52 }
 0x13c   :  { %1878 = vpow2.f32 %v303_v23  ;;  %1815 = vset.pattern.permute.xlu2 %v1961_v51 }
 0x13d   :  { %v284_v25 = vpop.f32.mrf.mxu2  ;;  %453 = vperm.xlu2 %1815, %v1877_v22   ;;  %v232_v30 = vpop.f32.mrf.mxu1 }
 0x13e   :  { %v285_v26 = vadd.f32 %v284_v25, %v229_v24 }
 0x140   :  { %v295_v27 = vadd.f32 %v290_v54, %v285_v26 }
 0x141   :  { %v2222_v48 = vpop.f32.mrf.mxu0 }
 0x142   :  { %v1879_v28 = vpop.eup %1878  ;;  %v305_v29 = vmul.f32 1.442695, %v295_v27 }
 0x143   :  { %517 = vperm.xlu1 %1817, %v1879_v28   ;;  %1818 = vset.pattern.permute.xlu0 %v1961_v51 }
 0x144   :  { %1880 = vpow2.f32 %v305_v29 }
 0x145   :  { %v287_v31 = vpop.f32.mrf.mxu2  ;;  %457 = vperm.xlu2 %1815, %v1879_v28  }
 0x146   :  { %v288_v32 = vadd.f32 %v287_v31, %v232_v30 }
 0x148   :  { %v296_v33 = vadd.f32 %v290_v54, %v288_v32 }
 0x149   :  { %v403_v54 = vpop.f32.mrf.mxu0 }
 0x14a   :  { %v1881_v34 = vpop.eup %1880  ;;  %v307_v35 = vmul.f32 1.442695, %v296_v33 }
 0x14b   :  { %461 = vperm.xlu0 %1818, %v1881_v34   ;;  %521 = vperm.xlu1 %1817, %v1881_v34  }
 0x14c   :  { %1882 = vpow2.f32 %v307_v35 }
 0x14d   :  { %1821 = vset.pattern.permute.xlu2 %v1963_v36 }
 0x14e   :  { %420 = vperm.xlu2 %1821, %v1877_v22   ;;  %v1795_v22 = vld [vmem:[%s2574_s25 + $0x10] sm:$0xff] }
 0x151   :  { %v405_v60 = vpop.f32.mrf.mxu0 }
 0x152   :  { %v1883_v37 = vpop.eup %1882 }
 0x153   :  { %465 = vperm.xlu0 %1818, %v1883_v37   ;;  %525 = vperm.xlu1 %1817, %v1883_v37  }
 0x156   :  { %435 = vperm.xlu2 %1821, %v1883_v37  }
 0x15b   :  { %1819 = vset.pattern.permute.xlu0 %v1962_v52  ;;  %1820 = vset.pattern.permute.xlu1 %v1963_v36 }
 0x15c   :  { %509 = vperm.xlu0 %1819, %v1875_v18   ;;  %430 = vperm.xlu1 %1820, %v1881_v34   ;;  %v635_v34 = vld [vmem:[%s2539_s9] sm:$0x3]  ;;  %s1968_s9 = smov 8  }
 0x15d   :  { %1712 = vmatpush.msk.msrb.mxu2 %vm127_vm0, %v635_v34 }
 0x15e   :  { %1713 = vmatmul.msk.f32.vlgmr.msrb.gmra.mxu2 %vm108_vm1, %v2095_v1 }
 0x164   :  { %1822 = vset.pattern.permute.xlu0 %v1963_v36  ;;  %415 = vperm.xlu1 %1820, %v1875_v18  }
 0x165   :  { %425 = vperm.xlu0 %1822, %v1879_v28  }
 0x166   :  { %1714 = vmatmul.msk.f32.gmra.mxu2 %vm108_vm1, %v2103_v2 }
 0x16d   :  { %410 = vperm.xlu0 %1822, %v1873_v0  }
 0x16e   :  { %1715 = vmatmul.msk.f32.gmra.mxu2 %vm108_vm1, %v2127_v7 }
 0x176   :  { %1716 = vmatmul.msk.f32.gmra.mxu2 %vm108_vm1, %v2136_v8 }
 0x17e   :  { %1717 = vmatmul.msk.f32.gmra.mxu2 %vm108_vm1, %v2148_v10 }
 0x185   :  { %v446_v39 = vpop.permute.xlu2 %445 }
 0x186   :  { %v468_v13 = vmul.f32 %v446_v39, %v2213_v38  ;;  %1718 = vmatmul.msk.f32.gmra.mxu2 %vm108_vm1, %v2157_v11 }
 0x18e   :  { %v506_v41 = vpop.permute.xlu2 %505 }
 0x18f   :  { %v528_v15 = vmul.f32 %v506_v41, %v2213_v38 }
 0x197   :  { %v454_v43 = vpop.permute.xlu2 %453 }
 0x198   :  { %v470_v44 = vmul.f32 %v454_v43, %v2217_v42 }
 0x19a   :  { %484 = vrot.lane.b32.xlu1 %v470_v44, %s1964_s8 }
 0x19f   :  { %v458_v49 = vpop.permute.xlu2 %457 }
 0x1a0   :  { %v471_v53 = vmul.f32 %v458_v49, %v2222_v48 }
 0x1a5   :  { %v450_v45 = vpop.permute.xlu1 %449 }
 0x1a6   :  { %v469_v59 = vmul.f32 %v450_v45, %v2215_v40 }
 0x1a8   :  { %v421_v21 = vpop.permute.xlu2 %420 }
 0x1a9   :  { %v440_v43 = vmul.f32 %v421_v21, %v2217_v42 }
 0x1ad   :  { %v514_v46 = vpop.permute.xlu0 %513 }
 0x1ae   :  { %v530_v47 = vmul.f32 %v514_v46, %v2217_v42 }
 0x1b0   :  { %544 = vrot.lane.b32.xlu2 %v530_v47, %s1965_s7  ;;  %v436_v23 = vpop.permute.xlu2 %435 }
 0x1b1   :  { %v443_v37 = vmul.f32 %v436_v23, %v405_v60 }
 0x1b5   :  { %v518_v50 = vpop.permute.xlu1 %517 }
 0x1b6   :  { %v531_v63 = vmul.f32 %v518_v50, %v2222_v48 }
 0x1b8   :  { %486 = vrot.lane.b32.xlu2 %v471_v53, %s1964_s8 }
 0x1bd   :  { %v462_v55 = vpop.permute.xlu0 %461  ;;  %v522_v56 = vpop.permute.xlu1 %521 }
 0x1be   :  { %v472_v57 = vmul.f32 %v462_v55, %v403_v54  ;;  %v532_v58 = vmul.f32 %v522_v56, %v403_v54 }
 0x1c0   :  { %488 = vrot.lane.b32.xlu0 %v472_v57, %s1964_s8  ;;  %548 = vrot.lane.b32.xlu1 %v532_v58, %s1965_s7 }
 0x1c1   :  { %482 = vrot.lane.b32.xlu2 %v469_v59, %s1964_s8 }
 0x1c5   :  { %v466_v61 = vpop.permute.xlu0 %465  ;;  %v526_v62 = vpop.permute.xlu1 %525 }
 0x1c6   :  { %v473_v0 = vmul.f32 %v466_v61, %v405_v60  ;;  %v533_v5 = vmul.f32 %v526_v62, %v405_v60 }
 0x1c8   :  { %546 = vrot.lane.b32.xlu0 %v531_v63, %s1965_s7  ;;  %490 = vrot.lane.b32.xlu1 %v473_v0, %s1964_s8 }
 0x1c9   :  { %550 = vrot.lane.b32.xlu2 %v533_v5, %s1965_s7 }
 0x1ce   :  { %v510_v16 = vpop.permute.xlu0 %509  ;;  %v431_v24 = vpop.permute.xlu1 %430 }
 0x1cf   :  { %v529_v18 = vmul.f32 %v510_v16, %v2215_v40  ;;  %v442_v35 = vmul.f32 %v431_v24, %v403_v54  ;;  %v1855_v16 = vld [vmem:[%s2540_s10] ss:$0 sm:$0xff] }
 0x1d0   :  { %540 = vrot.lane.b32.xlu0 %v528_v15, %s1965_s7  ;;  %480 = vrot.lane.b32.xlu1 %v468_v13, %s1964_s8 }
 0x1d6   :  { %v416_v27 = vpop.permute.xlu1 %415 }
 0x1d7   :  { %v426_v26 = vpop.permute.xlu0 %425 }
 0x1d8   :  { %542 = vrot.lane.b32.xlu1 %v529_v18, %s1965_s7  ;;  %621 = vperm.xlu0 %1822, %v94_v17   ;;  %v441_v44 = vmul.f32 %v426_v26, %v2222_v48  ;;  %v439_v48 = vmul.f32 %v416_v27, %v2215_v40  ;;  %v2286_v40 = vld [vmem:[%s2541_s11] sm:$0x1f] }
 0x1d9   :  { %v696_v15 = vrot.slane %v2286_v40, 2 }
 0x1db   :  { %1719 = vmatpush.msk.msrb.mxu3 %vm127_vm0, %v696_v15  ;;  %v1799_v15 = vld [vmem:[%s2542_s12 + $0x8] sm:$0xff] }
 0x1dc   :  { %881 = vmatpush.bf16.msra.mxu2 %v1799_v15 }
 0x1df   :  { %v411_v29 = vpop.permute.xlu0 %410 }
 0x1e0   :  { %626 = vperm.xlu1 %1820, %v95_v12   ;;  %1823 = vset.pattern.permute.xlu0 %v1961_v51  ;;  %v438_v42 = vmul.f32 %v411_v29, %v2213_v38 }
 0x1e1   :  { %v665_v17 = vpop.f32.mrf.mxu2 }
 0x1e2   :  { %v666_v18 = vadd.f32 %v1855_v16, %v665_v17  ;;  %v1798_v17 = vld [vmem:[%s2542_s12] sm:$0xff] }
 0x1e3   :  { %882 = vmatpush.bf16.msra.mxu2 %v1798_v17 }
 0x1e4   :  { %1884 = vtanh.f32 %v666_v18 }
 0x1e8   :  { %1824 = vset.pattern.permute.xlu1 %v1962_v52 }
 0x1e9   :  { %v668_v12 = vpop.f32.mrf.mxu2 }
 0x1ef   :  { %585 = vxpose.xlu2.c.b16.start [1/3] (short) (narrow) %v1793_v19, 16  ;;  %v1885_v19 = vpop.eup %1884 }
 0x1f0   :  { %v689_v21 = vmul.f32 %v1885_v19, %v1885_v19  ;;  %1720 = vmatmul.msk.f32.vlgmr.msrb.gmra.mxu3 %vm108_vm1, %v1885_v19 }
 0x1f1   :  { %v671_v24 = vpop.f32.mrf.mxu2 }
 0x1ff   :  { %586 = vxpose.xlu2.c.b16.cont [2/3] (short) (narrow) %v1794_v20, 16  ;;  %v669_v20 = vadd.f32 %v1855_v16, %v668_v12 }
 0x201   :  { %1886 = vtanh.f32 %v669_v20 }
 0x20a   :  { %v545_v25 = vpop.permute.xlu2 %544 }
 0x20c   :  { %v485_v30 = vpop.permute.xlu1 %484 }
 0x20d   :  { %v500_v49 = vadd.f32 %v485_v30, %v440_v43 }
 0x20f   :  { %587 = vxpose.xlu2.c.b16.end [3/3] (short) (narrow) %v1795_v22, 16  ;;  %v560_v54 = vadd.f32 %v545_v25, %v500_v49  ;;  %v1887_v22 = vpop.eup %1886  ;;  %v672_v25 = vadd.f32 %v1855_v16, %v671_v24 }
 0x210   :  { %1721 = vmatmul.msk.f32.gmra.mxu3 %vm108_vm1, %v1887_v22  ;;  %v690_v23 = vmul.f32 %v1887_v22, %v1887_v22 }
 0x211   :  { %1888 = vtanh.f32 %v672_v25 }
 0x212   :  { %v487_v28 = vpop.permute.xlu2 %486 }
 0x213   :  { %v501_v50 = vadd.f32 %v487_v28, %v441_v44  ;;  %v674_v28 = vpop.f32.mrf.mxu2 }
 0x214   :  { %v675_v29 = vadd.f32 %v1855_v16, %v674_v28 }
 0x216   :  { %1890 = vtanh.f32 %v675_v29 }
 0x217   :  { %v1889_v26 = vpop.eup %1888 }
 0x218   :  { %1722 = vmatmul.msk.f32.gmra.mxu3 %vm108_vm1, %v1889_v26  ;;  %v691_v27 = vmul.f32 %v1889_v26, %v1889_v26 }
 0x21b   :  { %v483_v31 = vpop.permute.xlu2 %482  ;;  %v677_v30 = vpop.f32.mrf.mxu2 }
 0x21c   :  { %v499_v61 = vadd.f32 %v483_v31, %v439_v48  ;;  %v1891_v31 = vpop.eup %1890 }
 0x220   :  { %1723 = vmatmul.msk.f32.gmra.mxu3 %vm108_vm1, %v1891_v31 }
 0x223   :  { %v551_v46 = vpop.permute.xlu2 %550 }
 0x232   :  { %v489_v32 = vpop.permute.xlu0 %488  ;;  %v549_v33 = vpop.permute.xlu1 %548 }
 0x233   :  { %v502_v39 = vadd.f32 %v489_v32, %v442_v35  ;;  %v678_v32 = vadd.f32 %v1855_v16, %v677_v30 }
 0x235   :  { %v562_v53 = vadd.f32 %v549_v33, %v502_v39  ;;  %v692_v33 = vmul.f32 %v1891_v31, %v1891_v31  ;;  %1892 = vtanh.f32 %v678_v32  ;;  %v680_v39 = vpop.f32.mrf.mxu2 }
 0x236   :  { %v681_v44 = vadd.f32 %v1855_v16, %v680_v39 }
 0x238   :  { %1894 = vtanh.f32 %v681_v44 }
 0x23a   :  { %v491_v41 = vpop.permute.xlu1 %490  ;;  %v547_v47 = vpop.permute.xlu0 %546 }
 0x23b   :  { %v503_v45 = vadd.f32 %v491_v41, %v443_v37  ;;  %v561_v56 = vadd.f32 %v547_v47, %v501_v50  ;;  %v1893_v35 = vpop.eup %1892 }
 0x23c   :  { %1724 = vmatmul.msk.f32.gmra.mxu3 %vm108_vm1, %v1893_v35  ;;  %v693_v41 = vmul.f32 %v1893_v35, %v1893_v35 }
 0x23d   :  { %v563_v55 = vadd.f32 %v551_v46, %v503_v45  ;;  %v565_v59 = vpack.c.bf16 %v561_v56, %v560_v54 }
 0x23f   :  { %v566_v57 = vpack.c.bf16 %v563_v55, %v562_v53  ;;  %v1895_v53 = vpop.eup %1894 }
 0x240   :  { %v694_v54 = vmul.f32 %v1895_v53, %v1895_v53 }
 0x241   :  { %610 = vmatpush.bf16.msrb.mxu1 %v566_v57 }
 0x242   :  { %v481_v58 = vpop.permute.xlu1 %480  ;;  %v541_v62 = vpop.permute.xlu0 %540 }
 0x243   :  { %v498_v60 = vadd.f32 %v481_v58, %v438_v42 }
 0x244   :  { %1725 = vmatmul.msk.f32.gmra.mxu3 %vm108_vm1, %v1895_v53 }
 0x245   :  { %611 = vmatpush.bf16.msrb.mxu1 %v565_v59  ;;  %v558_v0 = vadd.f32 %v541_v62, %v498_v60 }
 0x24a   :  { %v543_v63 = vpop.permute.xlu1 %542  ;;  %v2304_v37 = vpop.permute.xlu0 %621 }
 0x24b   :  { %v559_v5 = vadd.f32 %v543_v63, %v499_v61 }
 0x24d   :  { %v564_v13 = vpack.c.bf16 %v559_v5, %v558_v0 }
 0x24f   :  { %612 = vmatpush.bf16.msrb.mxu1 %v564_v13 }
 0x252   :  { %v2308_v45 = vpop.permute.xlu1 %626 }
 0x253   :  { %1726 = vmatpush.msk.msra.mxu1 %vm127_vm0, %v2286_v40 }
 0x271   :  { %1826 = vset.pattern.permute.xlu2 %v1962_v52 }
 0x273   :  { %v734_v58 = vpop.f32.mrf.mxu3 }
 0x290   :  { %v2279_v38 = vpop.trf.xlu2 }
 0x291   :  { %1711 = vmatmul.msk.bf16.vlgmr.msrb.gmra.mxu1 %vm601_vm4, %v2279_v38 }
 0x2a1   :  { %1727 = vmatmul.msk.f32.vlgmr.msra.gmra.mxu1 %vm108_vm1, %v689_v21 }
 0x2a9   :  { %1728 = vmatmul.msk.f32.gmra.mxu1 %vm108_vm1, %v690_v23 }
 0x2b1   :  { %1729 = vmatmul.msk.f32.gmra.mxu1 %vm108_vm1, %v691_v27 }
 0x2b9   :  { %1730 = vmatmul.msk.f32.gmra.mxu1 %vm108_vm1, %v692_v33 }
 0x2c1   :  { %1731 = vmatmul.msk.f32.gmra.mxu1 %vm108_vm1, %v693_v41 }
 0x2c9   :  { %1732 = vmatmul.msk.f32.gmra.mxu1 %vm108_vm1, %v694_v54 }
 0x30e   :  { %v614_v34 = vpop.f32.mrf.mxu1 }
 0x30f   :  { %v629_v43 = vmul.f32 %v2304_v37, %v614_v34 }
 0x311   :  { %v631_v47 = vmax.f32 %v629_v43, 0.0 }
 0x313   :  { %v2312_v55 = vadd.f32 %v631_v47, %v2110_v3 }
 0x316   :  { %v616_v46 = vpop.f32.mrf.mxu1 }
 0x317   :  { %v630_v49 = vmul.f32 %v2308_v45, %v616_v46 }
 0x319   :  { %v632_v50 = vmax.f32 %v630_v49, 0.0 }
 0x31b   :  { %v2315_v56 = vadd.f32 %v632_v50, %v2115_v4  ;;  %v2328_v4 = vperm.slane %v2286_v40, 4 }
 0x31d   :  { %v826_v57 = vpack.c.bf16 %v2315_v56, %v2312_v55 }
 0x31e   :  { %v789_v3 = vpop.f32.mrf.mxu1 }
 0x31f   :  { %834 = vmatpush.bf16.msra.mxu0 %v826_v57  ;;  %v790_v59 = vadd.f32 %v789_v3, %v734_v58 }
 0x321   :  { %v808_v42 = vadd.f32 %v2328_v4, %v790_v59 }
 0x322   :  { %1733 = vmatmul.msk.bf16.vlgmr.msra.gmra.mxu0 %vm325_vm2, %v2122_v6  ;;  %v737_v6 = vpop.f32.mrf.mxu3 }
 0x323   :  { %v814_v48 = vmul.f32 1.442695, %v808_v42 }
 0x325   :  { %1896 = vpow2.f32 %v814_v48 }
 0x326   :  { %v792_v60 = vpop.f32.mrf.mxu1 }
 0x327   :  { %v793_v61 = vadd.f32 %v792_v60, %v737_v6 }
 0x329   :  { %v809_v62 = vadd.f32 %v2328_v4, %v793_v61 }
 0x32a   :  { %v740_v0 = vpop.f32.mrf.mxu3 }
 0x32b   :  { %v1897_v63 = vpop.eup %1896 }
 0x32c   :  { %996 = vperm.xlu1 %1824, %v1897_v63   ;;  %936 = vperm.xlu0 %1823, %v1897_v63  }
 0x32e   :  { %v795_v5 = vpop.f32.mrf.mxu1 }
 0x32f   :  { %v796_v13 = vadd.f32 %v795_v5, %v740_v0 }
 0x331   :  { %v810_v40 = vadd.f32 %v2328_v4, %v796_v13 }
 0x332   :  { %1734 = vmatmul.msk.bf16.gmra.mxu0 %vm325_vm2, %v2143_v9  ;;  %v816_v9 = vmul.f32 1.442695, %v809_v62  ;;  %v743_v19 = vpop.f32.mrf.mxu3 }
 0x333   :  { %v818_v16 = vmul.f32 1.442695, %v810_v40 }
 0x334   :  { %1898 = vpow2.f32 %v816_v9  ;;  %1825 = vset.pattern.permute.xlu1 %v1961_v51  ;;  %1828 = vset.pattern.permute.xlu0 %v1963_v36 }
 0x335   :  { %1900 = vpow2.f32 %v818_v16 }
 0x336   :  { %v798_v12 = vpop.f32.mrf.mxu1 }
 0x337   :  { %v799_v20 = vadd.f32 %v798_v12, %v743_v19 }
 0x339   :  { %v811_v21 = vadd.f32 %v2328_v4, %v799_v20 }
 0x33a   :  { %v746_v24 = vpop.f32.mrf.mxu3 }
 0x33b   :  { %v820_v22 = vmul.f32 1.442695, %v811_v21 }
 0x33d   :  { %1902 = vpow2.f32 %v820_v22 }
 0x33e   :  { %v801_v25 = vpop.f32.mrf.mxu1 }
 0x33f   :  { %v802_v26 = vadd.f32 %v801_v25, %v746_v24 }
 0x341   :  { %v812_v27 = vadd.f32 %v2328_v4, %v802_v26 }
 0x342   :  { %1735 = vmatmul.msk.bf16.gmra.mxu0 %vm325_vm2, %v2173_v14  ;;  %v1899_v14 = vpop.eup %1898  ;;  %v749_v33 = vpop.f32.mrf.mxu3 }
 0x343   :  { %940 = vperm.xlu1 %1825, %v1899_v14   ;;  %1000 = vperm.xlu2 %1826, %v1899_v14   ;;  %v1901_v18 = vpop.eup %1900  ;;  %v822_v29 = vmul.f32 1.442695, %v812_v27 }
 0x344   :  { %906 = vperm.xlu0 %1828, %v1899_v14   ;;  %v1903_v23 = vpop.eup %1902 }
 0x345   :  { %1904 = vpow2.f32 %v822_v29 }
 0x346   :  { %v804_v34 = vpop.f32.mrf.mxu1 }
 0x347   :  { %v805_v35 = vadd.f32 %v804_v34, %v749_v33 }
 0x349   :  { %v813_v39 = vadd.f32 %v2328_v4, %v805_v35  ;;  %v1078_v35 = vld [vmem:[%s2543_s13] sm:$0x3] }
 0x34a   :  { %1748 = vmatpush.msk.msrb.mxu1 %vm127_vm0, %v1078_v35 }
 0x34b   :  { %1827 = vset.pattern.permute.xlu1 %v1963_v36  ;;  %1842 = vset.pattern.permute.xlu2 %v1961_v51  ;;  %v1905_v30 = vpop.eup %1904  ;;  %v824_v41 = vmul.f32 1.442695, %v813_v39 }
 0x34c   :  { %901 = vperm.xlu1 %1827, %v1897_v63   ;;  %1830 = vset.pattern.permute.xlu0 %v1962_v52 }
 0x34d   :  { %1004 = vperm.xlu0 %1830, %v1901_v18   ;;  %1906 = vpow2.f32 %v824_v41  ;;  %1749 = vmatmul.msk.f32.vlgmr.msrb.gmra.mxu1 %vm108_vm1, %v2095_v1 }
 0x353   :  { %v1907_v44 = vpop.eup %1906 }
 0x354   :  { %1829 = vset.pattern.permute.xlu1 %v1961_v51 }
 0x355   :  { %944 = vperm.xlu1 %1829, %v1901_v18   ;;  %1834 = vset.pattern.permute.xlu0 %v1963_v36 }
 0x356   :  { %916 = vperm.xlu0 %1834, %v1903_v23   ;;  %1750 = vmatmul.msk.f32.gmra.mxu1 %vm108_vm1, %v2103_v2 }
 0x35d   :  { %1831 = vset.pattern.permute.xlu1 %v1963_v36 }
 0x35e   :  { %911 = vperm.xlu1 %1831, %v1901_v18   ;;  %1835 = vset.pattern.permute.xlu0 %v1961_v51 }
 0x35f   :  { %952 = vperm.xlu0 %1835, %v1905_v30   ;;  %1751 = vmatmul.msk.f32.gmra.mxu1 %vm108_vm1, %v2127_v7 }
 0x366   :  { %1832 = vset.pattern.permute.xlu1 %v1961_v51 }
 0x367   :  { %948 = vperm.xlu1 %1832, %v1903_v23   ;;  %1836 = vset.pattern.permute.xlu0 %v1963_v36 }
 0x368   :  { %921 = vperm.xlu0 %1836, %v1905_v30   ;;  %1752 = vmatmul.msk.f32.gmra.mxu1 %vm108_vm1, %v2136_v8 }
 0x36f   :  { %1833 = vset.pattern.permute.xlu1 %v1962_v52 }
 0x370   :  { %1008 = vperm.xlu1 %1833, %v1903_v23   ;;  %1838 = vset.pattern.permute.xlu0 %v1962_v52 }
 0x371   :  { %1016 = vperm.xlu0 %1838, %v1907_v44   ;;  %1753 = vmatmul.msk.f32.gmra.mxu1 %vm108_vm1, %v2148_v10 }
 0x378   :  { %1012 = vperm.xlu1 %1833, %v1905_v30  }
 0x379   :  { %1844 = vset.pattern.permute.xlu0 %v1961_v51  ;;  %1754 = vmatmul.msk.f32.gmra.mxu1 %vm108_vm1, %v2157_v11 }
 0x380   :  { %1837 = vset.pattern.permute.xlu1 %v1961_v51 }
 0x381   :  { %956 = vperm.xlu1 %1837, %v1907_v44  }
 0x389   :  { %1839 = vset.pattern.permute.xlu1 %v1963_v36 }
 0x38a   :  { %926 = vperm.xlu1 %1839, %v1907_v44  }
 0x392   :  { %1840 = vset.pattern.permute.xlu1 %v1961_v51 }
 0x39d   :  { %v1001_v33 = vpop.permute.xlu2 %1000 }
 0x39e   :  { %v997_v57 = vpop.permute.xlu1 %996  ;;  %v937_v4 = vpop.permute.xlu0 %936 }
 0x39f   :  { %v836_v28 = vpop.f32.mrf.mxu0 }
 0x3a7   :  { %v838_v31 = vpop.f32.mrf.mxu0 }
 0x3a8   :  { %v851_v32 = vpack.c.bf16 %v838_v31, %v836_v28 }
 0x3aa   :  { %1744 = vmatmul.msk.bf16.vlgmr.msra.gmra.mxu2 %vm374_vm3, %v851_v32 }
 0x3af   :  { %v841_v43 = vpop.f32.mrf.mxu0 }
 0x3b5   :  { %v941_v54 = vpop.permute.xlu1 %940 }
 0x3b6   :  { %v907_v59 = vpop.permute.xlu0 %906 }
 0x3b7   :  { %v843_v46 = vpop.f32.mrf.mxu0 }
 0x3b8   :  { %v852_v47 = vpack.c.bf16 %v843_v46, %v841_v43 }
 0x3ba   :  { %1745 = vmatmul.msk.bf16.gmra.mxu2 %vm374_vm3, %v852_v47 }
 0x3be   :  { %v902_v3 = vpop.permute.xlu1 %901 }
 0x3bf   :  { %v846_v49 = vpop.f32.mrf.mxu0  ;;  %v1005_v61 = vpop.permute.xlu0 %1004 }
 0x3c7   :  { %v848_v50 = vpop.f32.mrf.mxu0  ;;  %v945_v58 = vpop.permute.xlu1 %944 }
 0x3c8   :  { %v853_v53 = vpack.c.bf16 %v848_v50, %v846_v49  ;;  %v917_v0 = vpop.permute.xlu0 %916 }
 0x3ca   :  { %1746 = vmatmul.msk.bf16.gmra.mxu2 %vm374_vm3, %v853_v53 }
 0x3d0   :  { %v912_v6 = vpop.permute.xlu1 %911 }
 0x3d1   :  { %v953_v16 = vpop.permute.xlu0 %952 }
 0x3d9   :  { %v949_v14 = vpop.permute.xlu1 %948 }
 0x3da   :  { %v922_v21 = vpop.permute.xlu0 %921 }
 0x3e2   :  { %v1009_v15 = vpop.permute.xlu1 %1008 }
 0x3e3   :  { %v1017_v30 = vpop.permute.xlu0 %1016 }
 0x3ea   :  { %v1013_v20 = vpop.permute.xlu1 %1012 }
 0x3f3   :  { %v957_v26 = vpop.permute.xlu1 %956 }
 0x3fc   :  { %v927_v39 = vpop.permute.xlu1 %926 }
 0x42d   :  { %v884_v42 = vpop.f32.mrf.mxu2 }
 0x42e   :  { %v959_v48 = vmul.f32 %v937_v4, %v884_v42  ;;  %v2362_v60 = vmul.f32 %v902_v3, %v884_v42  ;;  %v1019_v31 = vmul.f32 %v997_v57, %v884_v42 }
 0x430   :  { %971 = vrot.lane.b32.xlu1 %v959_v48, %s1964_s8 }
 0x435   :  { %v886_v62 = vpop.f32.mrf.mxu2 }
 0x436   :  { %v960_v63 = vmul.f32 %v941_v54, %v886_v62  ;;  %v2365_v9 = vmul.f32 %v907_v59, %v886_v62  ;;  %v1020_v34 = vmul.f32 %v1001_v33, %v886_v62 }
 0x438   :  { %973 = vrot.lane.b32.xlu0 %v960_v63, %s1964_s8 }
 0x43d   :  { %v889_v5 = vpop.f32.mrf.mxu2 }
 0x43e   :  { %v961_v13 = vmul.f32 %v945_v58, %v889_v5  ;;  %v931_v40 = vmul.f32 %v912_v6, %v889_v5  ;;  %v1021_v18 = vmul.f32 %v1005_v61, %v889_v5  ;;  %v2401_v5 = vld [vmem:[%s2545_s15] sm:$0x1f] }
 0x43f   :  { %1762 = vmatpush.msk.msrb.mxu0 %vm127_vm0, %v2401_v5 }
 0x440   :  { %975 = vrot.lane.b32.xlu1 %v961_v13, %s1964_s8  ;;  %v1139_v13 = vrot.slane %v2401_v5, 2 }
 0x445   :  { %v891_v17 = vpop.f32.mrf.mxu2 }
 0x446   :  { %v962_v12 = vmul.f32 %v949_v14, %v891_v17  ;;  %v932_v19 = vmul.f32 %v917_v0, %v891_v17  ;;  %v1022_v23 = vmul.f32 %v1009_v15, %v891_v17 }
 0x448   :  { %1035 = vrot.lane.b32.xlu1 %v1021_v18, %s1965_s7  ;;  %977 = vrot.lane.b32.xlu0 %v962_v12, %s1964_s8 }
 0x44d   :  { %v894_v22 = vpop.f32.mrf.mxu2 }
 0x44e   :  { %v963_v24 = vmul.f32 %v953_v16, %v894_v22  ;;  %v933_v25 = vmul.f32 %v922_v21, %v894_v22  ;;  %v1023_v28 = vmul.f32 %v1013_v20, %v894_v22 }
 0x450   :  { %1037 = vrot.lane.b32.xlu0 %v1022_v23, %s1965_s7  ;;  %979 = vrot.lane.b32.xlu1 %v963_v24, %s1964_s8 }
 0x455   :  { %v896_v27 = vpop.f32.mrf.mxu2 }
 0x456   :  { %v964_v29 = vmul.f32 %v957_v26, %v896_v27  ;;  %v1024_v32 = vmul.f32 %v1017_v30, %v896_v27  ;;  %v934_v8 = vmul.f32 %v927_v39, %v896_v27 }
 0x458   :  { %1039 = vrot.lane.b32.xlu1 %v1023_v28, %s1965_s7  ;;  %981 = vrot.lane.b32.xlu0 %v964_v29, %s1964_s8 }
 0x460   :  { %1031 = vrot.lane.b32.xlu1 %v1019_v31, %s1965_s7  ;;  %1041 = vrot.lane.b32.xlu0 %v1024_v32, %s1965_s7 }
 0x468   :  { %1033 = vrot.lane.b32.xlu0 %v1020_v34, %s1965_s7 }
 0x4a2   :  { %v972_v41 = vpop.permute.xlu1 %971 }
 0x4a3   :  { %v989_v61 = vadd.f32 %v972_v41, %v2362_v60  ;;  %v1856_v60 = vld [vmem:[%s2544_s14] ss:$0 sm:$0xff] }
 0x4aa   :  { %v974_v43 = vpop.permute.xlu0 %973 }
 0x4ab   :  { %v990_v11 = vadd.f32 %v974_v43, %v2365_v9  ;;  %v1108_v9 = vpop.f32.mrf.mxu1 }
 0x4b2   :  { %v976_v44 = vpop.permute.xlu1 %975 }
 0x4b3   :  { %v991_v49 = vadd.f32 %v976_v44, %v931_v40  ;;  %v1109_v40 = vadd.f32 %v1856_v60, %v1108_v9  ;;  %v1111_v15 = vpop.f32.mrf.mxu1 }
 0x4b4   :  { %v1112_v17 = vadd.f32 %v1856_v60, %v1111_v15 }
 0x4b5   :  { %1908 = vtanh.f32 %v1109_v40 }
 0x4b6   :  { %1910 = vtanh.f32 %v1112_v17 }
 0x4ba   :  { %v1036_v46 = vpop.permute.xlu1 %1035  ;;  %v978_v47 = vpop.permute.xlu0 %977 }
 0x4bb   :  { %v992_v1 = vadd.f32 %v978_v47, %v932_v19  ;;  %v1051_v50 = vadd.f32 %v1036_v46, %v991_v49  ;;  %v1909_v16 = vpop.eup %1908  ;;  %v1114_v12 = vpop.f32.mrf.mxu1 }
 0x4bc   :  { %v1132_v18 = vmul.f32 %v1909_v16, %v1909_v16  ;;  %v1911_v19 = vpop.eup %1910  ;;  %v1115_v20 = vadd.f32 %v1856_v60, %v1114_v12 }
 0x4bd   :  { %v1133_v21 = vmul.f32 %v1911_v19, %v1911_v19 }
 0x4be   :  { %1763 = vmatmul.msk.f32.vlgmr.msrb.gmra.mxu0 %vm108_vm1, %v1132_v18  ;;  %1912 = vtanh.f32 %v1115_v20 }
 0x4c2   :  { %v1038_v2 = vpop.permute.xlu0 %1037  ;;  %v980_v7 = vpop.permute.xlu1 %979 }
 0x4c3   :  { %v1052_v53 = vadd.f32 %v1038_v2, %v992_v1  ;;  %v993_v4 = vadd.f32 %v980_v7, %v933_v25  ;;  %v1117_v22 = vpop.f32.mrf.mxu1 }
 0x4c4   :  { %v1913_v23 = vpop.eup %1912  ;;  %v1118_v24 = vadd.f32 %v1856_v60, %v1117_v22 }
 0x4c5   :  { %v1056_v57 = vpack.c.bf16 %v1052_v53, %v1051_v50  ;;  %v1134_v25 = vmul.f32 %v1913_v23, %v1913_v23  ;;  %v1932_v50 = vld [vmem:[%s2570_s4] sm:$0xff]  ;;  %v1933_v53 = vld [vmem:[%s2570_s4 + $0x8] sm:$0xff] }
 0x4c6   :  { %1764 = vmatmul.msk.f32.gmra.mxu0 %vm108_vm1, %v1133_v21  ;;  %1914 = vtanh.f32 %v1118_v24 }
 0x4ca   :  { %v982_v54 = vpop.permute.xlu0 %981  ;;  %v1040_v3 = vpop.permute.xlu1 %1039 }
 0x4cb   :  { %v994_v58 = vadd.f32 %v982_v54, %v934_v8  ;;  %v1053_v42 = vadd.f32 %v1040_v3, %v993_v4  ;;  %v1120_v26 = vpop.f32.mrf.mxu1 }
 0x4cc   :  { %v1915_v27 = vpop.eup %1914  ;;  %v1121_v28 = vadd.f32 %v1856_v60, %v1120_v26 }
 0x4cd   :  { %v1135_v29 = vmul.f32 %v1915_v27, %v1915_v27 }
 0x4ce   :  { %1765 = vmatmul.msk.f32.gmra.mxu0 %vm108_vm1, %v1134_v25  ;;  %1916 = vtanh.f32 %v1121_v28  ;;  %v1800_v28 = vld [vmem:[%s2546_s16] sm:$0xff] }
 0x4d2   :  { %v1042_v59 = vpop.permute.xlu0 %1041  ;;  %v1032_v6 = vpop.permute.xlu1 %1031 }
 0x4d3   :  { %v1054_v10 = vadd.f32 %v1042_v59, %v994_v58  ;;  %v1049_v63 = vadd.f32 %v1032_v6, %v989_v61  ;;  %v1123_v31 = vpop.f32.mrf.mxu1 }
 0x4d4   :  { %v1917_v30 = vpop.eup %1916  ;;  %v1124_v32 = vadd.f32 %v1856_v60, %v1123_v31 }
 0x4d5   :  { %v1057_v48 = vpack.c.bf16 %v1054_v10, %v1053_v42  ;;  %v1136_v33 = vmul.f32 %v1917_v30, %v1917_v30 }
 0x4d6   :  { %1766 = vmatmul.msk.f32.gmra.mxu0 %vm108_vm1, %v1135_v29  ;;  %1918 = vtanh.f32 %v1124_v32 }
 0x4d7   :  { %1063 = vmatpush.bf16.msra.mxu3 %v1057_v48 }
 0x4da   :  { %v1034_v62 = vpop.permute.xlu0 %1033 }
 0x4db   :  { %v1050_v14 = vadd.f32 %v1034_v62, %v990_v11  ;;  %1064 = vmatpush.bf16.msra.mxu3 %v1056_v57  ;;  %v1250_v57 = vperm.slane %v2401_v5, 4 }
 0x4dc   :  { %v1919_v34 = vpop.eup %1918 }
 0x4dd   :  { %v1055_v0 = vpack.c.bf16 %v1050_v14, %v1049_v63  ;;  %v1137_v35 = vmul.f32 %v1919_v34, %v1919_v34 }
 0x4de   :  { %1767 = vmatmul.msk.f32.gmra.mxu0 %vm108_vm1, %v1136_v33 }
 0x4df   :  { %1065 = vmatpush.bf16.msra.mxu3 %v1055_v0 }
 0x4e2   :  { %1747 = vmatmul.msk.bf16.vlgmr.msra.gmra.mxu3 %vm601_vm4, %v2279_v38 }
 0x4e3   :  { %1755 = vmatpush.msk.msrb.mxu3 %vm127_vm0, %v1139_v13 }
 0x4e6   :  { %1768 = vmatmul.msk.f32.gmra.mxu0 %vm108_vm1, %v1137_v35 }
 0x4f2   :  { %1756 = vmatmul.msk.f32.vlgmr.msrb.gmra.mxu3 %vm108_vm1, %v1909_v16 }
 0x4fa   :  { %1757 = vmatmul.msk.f32.gmra.mxu3 %vm108_vm1, %v1911_v19 }
 0x502   :  { %1758 = vmatmul.msk.f32.gmra.mxu3 %vm108_vm1, %v1913_v23 }
 0x50a   :  { %1759 = vmatmul.msk.f32.gmra.mxu3 %vm108_vm1, %v1915_v27  ;;  %v1801_v27 = vld [vmem:[%s2546_s16 + $0x8] sm:$0xff] }
 0x50b   :  { %1324 = vmatpush.bf16.msra.mxu1 %v1801_v27 }
 0x50f   :  { %1325 = vmatpush.bf16.msra.mxu1 %v1800_v28 }
 0x512   :  { %1760 = vmatmul.msk.f32.gmra.mxu3 %vm108_vm1, %v1917_v30 }
 0x51a   :  { %1761 = vmatmul.msk.f32.gmra.mxu3 %vm108_vm1, %v1919_v34 }
 0x565   :  { %v1067_v39 = vpop.f32.mrf.mxu3 }
 0x566   :  { %v1072_v41 = vmul.f32 %v1067_v39, %v2304_v37 }
 0x568   :  { %v1074_v44 = vmax.f32 %v1072_v41, 0.0 }
 0x56a   :  { %v2425_v49 = vadd.f32 %v1074_v44, %v2312_v55  ;;  %v1934_v55 = vld [vmem:[%s2570_s4 + $0x10] sm:$0xff]  ;;  %s1967_s4 = smov 128  }
 0x56d   :  { %v1069_v43 = vpop.f32.mrf.mxu3 }
 0x56e   :  { %v1073_v46 = vmul.f32 %v1069_v43, %v2308_v45 }
 0x570   :  { %v1075_v47 = vmax.f32 %v1073_v46, 0.0 }
 0x572   :  { %v2428_v1 = vadd.f32 %v1075_v47, %v2315_v56  ;;  %v1232_v56 = vpop.f32.mrf.mxu0 }
 0x574   :  { %v1269_v2 = vpack.c.bf16 %v2428_v1, %v2425_v49 }
 0x575   :  { %v1177_v7 = vpop.f32.mrf.mxu3 }
 0x576   :  { %1277 = vmatpush.bf16.msrb.mxu2 %v1269_v2  ;;  %v1233_v54 = vadd.f32 %v1232_v56, %v1177_v7 }
 0x578   :  { %v1251_v3 = vadd.f32 %v1250_v57, %v1233_v54 }
 0x579   :  { %1769 = vmatmul.msk.bf16.vlgmr.msrb.gmra.mxu2 %vm325_vm2, %v1932_v50 }
 0x57a   :  { %v1235_v8 = vpop.f32.mrf.mxu0  ;;  %v1257_v4 = vmul.f32 1.442695, %v1251_v3 }
 0x57c   :  { %1920 = vpow2.f32 %v1257_v4 }
 0x57d   :  { %v1180_v58 = vpop.f32.mrf.mxu3 }
 0x57e   :  { %v1236_v59 = vadd.f32 %v1235_v8, %v1180_v58 }
 0x580   :  { %v1252_v42 = vadd.f32 %v1250_v57, %v1236_v59 }
 0x582   :  { %v1921_v10 = vpop.eup %1920  ;;  %v1259_v48 = vmul.f32 1.442695, %v1252_v42  ;;  %v1238_v6 = vpop.f32.mrf.mxu0 }
 0x583   :  { %1379 = vperm.xlu1 %1840, %v1921_v10  }
 0x584   :  { %1922 = vpow2.f32 %v1259_v48 }
 0x585   :  { %v1183_v61 = vpop.f32.mrf.mxu3 }
 0x586   :  { %v1239_v11 = vadd.f32 %v1238_v6, %v1183_v61 }
 0x588   :  { %v1253_v62 = vadd.f32 %v1250_v57, %v1239_v11 }
 0x589   :  { %1770 = vmatmul.msk.bf16.gmra.mxu2 %vm325_vm2, %v1933_v53 }
 0x58a   :  { %v1923_v63 = vpop.eup %1922  ;;  %v1261_v14 = vmul.f32 1.442695, %v1253_v62  ;;  %v1241_v5 = vpop.f32.mrf.mxu0 }
 0x58b   :  { %1383 = vperm.xlu2 %1842, %v1923_v63   ;;  %1841 = vset.pattern.permute.xlu1 %v1962_v52 }
 0x58c   :  { %1924 = vpow2.f32 %v1261_v14  ;;  %1439 = vperm.xlu1 %1841, %v1921_v10  }
 0x58d   :  { %v1186_v0 = vpop.f32.mrf.mxu3 }
 0x58e   :  { %v1242_v13 = vadd.f32 %v1241_v5, %v1186_v0 }
 0x590   :  { %v1254_v60 = vadd.f32 %v1250_v57, %v1242_v13 }
 0x592   :  { %v1925_v9 = vpop.eup %1924  ;;  %v1263_v40 = vmul.f32 1.442695, %v1254_v60  ;;  %v1244_v16 = vpop.f32.mrf.mxu0 }
 0x593   :  { %1387 = vperm.xlu0 %1844, %v1925_v9   ;;  %1843 = vset.pattern.permute.xlu2 %v1962_v52 }
 0x594   :  { %1443 = vperm.xlu2 %1843, %v1923_v63   ;;  %1846 = vset.pattern.permute.xlu1 %v1961_v51  ;;  %1926 = vpow2.f32 %v1263_v40 }
 0x595   :  { %v1189_v15 = vpop.f32.mrf.mxu3 }
 0x596   :  { %v1245_v17 = vadd.f32 %v1244_v16, %v1189_v15 }
 0x598   :  { %v1255_v18 = vadd.f32 %v1250_v57, %v1245_v17 }
 0x599   :  { %1771 = vmatmul.msk.bf16.gmra.mxu2 %vm325_vm2, %v1934_v55 }
 0x59a   :  { %v1927_v12 = vpop.eup %1926  ;;  %v1265_v19 = vmul.f32 1.442695, %v1255_v18  ;;  %v1247_v21 = vpop.f32.mrf.mxu0 }
 0x59b   :  { %1847 = vset.pattern.permute.xlu0 %v1962_v52  ;;  %1391 = vperm.xlu1 %1846, %v1927_v12  }
 0x59c   :  { %1451 = vperm.xlu0 %1847, %v1927_v12   ;;  %1447 = vperm.xlu2 %1843, %v1925_v9   ;;  %1928 = vpow2.f32 %v1265_v19 }
 0x59d   :  { %v1192_v20 = vpop.f32.mrf.mxu3 }
 0x59e   :  { %v1248_v22 = vadd.f32 %v1247_v21, %v1192_v20 }
 0x5a0   :  { %v1256_v23 = vadd.f32 %v1250_v57, %v1248_v22 }
 0x5a2   :  { %v1929_v24 = vpop.eup %1928  ;;  %v1267_v25 = vmul.f32 1.442695, %v1256_v23 }
 0x5a3   :  { %1395 = vperm.xlu1 %1846, %v1929_v24  }
 0x5a4   :  { %1849 = vset.pattern.permute.xlu0 %v1963_v36  ;;  %1845 = vset.pattern.permute.xlu2 %v1963_v36  ;;  %1930 = vpow2.f32 %v1267_v25 }
 0x5a5   :  { %1364 = vperm.xlu0 %1849, %v1929_v24   ;;  %1354 = vperm.xlu2 %1845, %v1925_v9  }
 0x5aa   :  { %v1931_v26 = vpop.eup %1930 }
 0x5ab   :  { %1848 = vset.pattern.permute.xlu1 %v1962_v52 }
 0x5ac   :  { %1455 = vperm.xlu1 %1848, %v1929_v24  }
 0x5ad   :  { %1850 = vset.pattern.permute.xlu0 %v1961_v51  ;;  %1344 = vperm.xlu2 %1845, %v1921_v10  }
 0x5ae   :  { %1399 = vperm.xlu0 %1850, %v1931_v26  }
 0x5b4   :  { %1459 = vperm.xlu1 %1848, %v1931_v26  }
 0x5b6   :  { %1851 = vset.pattern.permute.xlu0 %v1963_v36 }
 0x5b7   :  { %1359 = vperm.xlu0 %1851, %v1927_v12  }
 0x5bc   :  { %1852 = vset.pattern.permute.xlu1 %v1963_v36 }
 0x5bd   :  { %1369 = vperm.xlu1 %1852, %v1931_v26  }
 0x5bf   :  { %1349 = vperm.xlu0 %1851, %v1923_v63  }
 0x5c7   :  { %1853 = vset.pattern.permute.xlu0 %v1962_v52 }
 0x5e5   :  { %v1384_v36 = vpop.permute.xlu2 %1383 }
 0x5ee   :  { %v1444_v46 = vpop.permute.xlu2 %1443 }
 0x5f5   :  { %v1380_v41 = vpop.permute.xlu1 %1379 }
 0x5f6   :  { %v1448_v53 = vpop.permute.xlu2 %1447 }
 0x5fc   :  { %v1279_v51 = vpop.f32.mrf.mxu2 }
 0x5fe   :  { %v1440_v44 = vpop.permute.xlu1 %1439 }
 0x5ff   :  { %v1355_v60 = vpop.permute.xlu2 %1354 }
 0x604   :  { %v1281_v29 = vpop.f32.mrf.mxu2 }
 0x605   :  { %v1294_v30 = vpack.c.bf16 %v1281_v29, %v1279_v51  ;;  %v1388_v2 = vpop.permute.xlu0 %1387 }
 0x607   :  { %1780 = vmatmul.msk.bf16.vlgmr.msra.gmra.mxu1 %vm374_vm3, %v1294_v30  ;;  %v1345_v15 = vpop.permute.xlu2 %1344 }
 0x60c   :  { %v1284_v31 = vpop.f32.mrf.mxu2 }
 0x60d   :  { %v1392_v50 = vpop.permute.xlu1 %1391 }
 0x60e   :  { %v1452_v57 = vpop.permute.xlu0 %1451 }
 0x614   :  { %v1286_v32 = vpop.f32.mrf.mxu2 }
 0x615   :  { %v1295_v33 = vpack.c.bf16 %v1286_v32, %v1284_v31  ;;  %v1396_v54 = vpop.permute.xlu1 %1395 }
 0x617   :  { %1781 = vmatmul.msk.bf16.gmra.mxu1 %vm374_vm3, %v1295_v33  ;;  %v1365_v59 = vpop.permute.xlu0 %1364 }
 0x61c   :  { %v1289_v34 = vpop.f32.mrf.mxu2 }
 0x61e   :  { %v1456_v42 = vpop.permute.xlu1 %1455 }
 0x620   :  { %v1400_v61 = vpop.permute.xlu0 %1399 }
 0x624   :  { %v1291_v35 = vpop.f32.mrf.mxu2 }
 0x625   :  { %v1296_v39 = vpack.c.bf16 %v1291_v35, %v1289_v34 }
 0x626   :  { %v1460_v11 = vpop.permute.xlu1 %1459 }
 0x627   :  { %1782 = vmatmul.msk.bf16.gmra.mxu1 %vm374_vm3, %v1296_v39 }
 0x629   :  { %v1360_v13 = vpop.permute.xlu0 %1359 }
 0x62f   :  { %v1370_v40 = vpop.permute.xlu1 %1369 }
 0x631   :  { %v1350_v9 = vpop.permute.xlu0 %1349 }
 0x684   :  { %v2465_v43 = vpop.f32.mrf.mxu1 }
 0x685   :  { %v1402_v52 = vmul.f32 %v1380_v41, %v2465_v43  ;;  %v1462_v0 = vmul.f32 %v1440_v44, %v2465_v43  ;;  %v1372_v41 = vmul.f32 %v1345_v15, %v2465_v43  ;;  %v1524_v43 = vld [vmem:[%s2547_s17 + $0x18] sm:$0xff] }
 0x687   :  { %1414 = vrot.lane.b32.xlu0 %v1402_v52, %s1964_s8 }
 0x68c   :  { %v2469_v47 = vpop.f32.mrf.mxu1 }
 0x68d   :  { %v1463_v8 = vmul.f32 %v1444_v46, %v2469_v47  ;;  %v1403_v5 = vmul.f32 %v1384_v36, %v2469_v47  ;;  %v1373_v36 = vmul.f32 %v1350_v9, %v2469_v47  ;;  %v1523_v47 = vld [vmem:[%s2547_s17 + $0x10] sm:$0xff] }
 0x694   :  { %v1332_v55 = vpop.f32.mrf.mxu1 }
 0x695   :  { %v1404_v56 = vmul.f32 %v1388_v2, %v1332_v55  ;;  %v1464_v7 = vmul.f32 %v1448_v53, %v1332_v55  ;;  %v1374_v19 = vmul.f32 %v1355_v60, %v1332_v55 }
 0x697   :  { %1478 = vrot.lane.b32.xlu1 %v1464_v7, %s1965_s7  ;;  %1418 = vrot.lane.b32.xlu0 %v1404_v56, %s1964_s8  ;;  %v1522_v7 = vld [vmem:[%s2547_s17 + $0x8] sm:$0xff] }
 0x69c   :  { %v1334_v3 = vpop.f32.mrf.mxu1 }
 0x69d   :  { %v1405_v4 = vmul.f32 %v1392_v50, %v1334_v3  ;;  %v1465_v58 = vmul.f32 %v1452_v57, %v1334_v3  ;;  %v1375_v21 = vmul.f32 %v1360_v13, %v1334_v3  ;;  %v1521_v57 = vld [vmem:[%s2547_s17] sm:$0xff] }
 0x69f   :  { %1476 = vrot.lane.b32.xlu0 %v1463_v8, %s1965_s7  ;;  %1480 = vrot.lane.b32.xlu2 %v1465_v58, %s1965_s7 }
 0x6a0   :  { %1420 = vrot.lane.b32.xlu1 %v1405_v4, %s1964_s8 }
 0x6a4   :  { %v1337_v10 = vpop.f32.mrf.mxu1 }
 0x6a5   :  { %v1406_v48 = vmul.f32 %v1396_v54, %v1337_v10  ;;  %v1466_v6 = vmul.f32 %v1456_v42, %v1337_v10  ;;  %v1376_v30 = vmul.f32 %v1365_v59, %v1337_v10  ;;  %v1561_v10 = vld [vmem:[%s2549_s19 + $0x8] sm:$0xff] }
 0x6a6   :  { %1586 = vmatpush.msra.mxu0 %v1561_v10 }
 0x6a7   :  { %1422 = vrot.lane.b32.xlu2 %v1406_v48, %s1964_s8 }
 0x6a8   :  { %1482 = vrot.lane.b32.xlu1 %v1466_v6, %s1965_s7 }
 0x6ac   :  { %v1339_v62 = vpop.f32.mrf.mxu1 }
 0x6ad   :  { %v1407_v63 = vmul.f32 %v1400_v61, %v1339_v62  ;;  %v1467_v14 = vmul.f32 %v1460_v11, %v1339_v62  ;;  %v1377_v29 = vmul.f32 %v1370_v40, %v1339_v62  ;;  %v1597_v62 = vld [vmem:[%s2551_s21] sm:$0xff]  ;;  %s1966_s21 = smov [#allocation2]  }
 0x6ae   :  { %1624 = vmatpush.msra.mxu2 %v1597_v62  ;;  %v1859_v40 = vld [vmem:[%s2552_s22] ss:$0 sm:$0xff]  ;;  %s1638_s6 = sshll.u32 %s1966_s21, 4  ;;  %s1639_s6 = int_to_ptr.vmem [resolvable:$true] %s1638_s6 }
 0x6af   :  { %1484 = vrot.lane.b32.xlu2 %v1467_v14, %s1965_s7 }
 0x6b0   :  { %1424 = vrot.lane.b32.xlu1 %v1407_v63, %s1964_s8  ;;  %v1858_v63 = vld [vmem:[%s2550_s20] ss:$0 sm:$0xff] }
 0x6b7   :  { %1474 = vrot.lane.b32.xlu2 %v1462_v0, %s1965_s7 }
 0x6b8   :  { %1416 = vrot.lane.b32.xlu1 %v1403_v5, %s1964_s8 }
 0x6f9   :  { %v1415_v16 = vpop.permute.xlu0 %1414  ;;  %v1481_v18 = vpop.permute.xlu2 %1480 }
 0x6fa   :  { %v1432_v46 = vadd.f32 %v1415_v16, %v1372_v41 }
 0x701   :  { %v1423_v26 = vpop.permute.xlu2 %1422 }
 0x702   :  { %v1436_v32 = vadd.f32 %v1423_v26, %v1376_v30 }
 0x709   :  { %v1479_v17 = vpop.permute.xlu1 %1478  ;;  %v1419_v12 = vpop.permute.xlu0 %1418 }
 0x70a   :  { %v1434_v20 = vadd.f32 %v1419_v12, %v1374_v19  ;;  %v1485_v51 = vpop.permute.xlu2 %1484 }
 0x70c   :  { %v1494_v24 = vadd.f32 %v1479_v17, %v1434_v20 }
 0x711   :  { %v1477_v50 = vpop.permute.xlu0 %1476 }
 0x712   :  { %v1421_v22 = vpop.permute.xlu1 %1420  ;;  %v1475_v52 = vpop.permute.xlu2 %1474 }
 0x713   :  { %v1435_v23 = vadd.f32 %v1421_v22, %v1375_v21  ;;  %v1492_v53 = vadd.f32 %v1475_v52, %v1432_v46 }
 0x715   :  { %v1495_v25 = vadd.f32 %v1481_v18, %v1435_v23 }
 0x717   :  { %v1499_v27 = vpack.c.bf16 %v1495_v25, %v1494_v24 }
 0x71a   :  { %v1483_v28 = vpop.permute.xlu1 %1482 }
 0x71b   :  { %v1496_v34 = vadd.f32 %v1483_v28, %v1436_v32 }
 0x722   :  { %v1425_v31 = vpop.permute.xlu1 %1424 }
 0x723   :  { %v1437_v33 = vadd.f32 %v1425_v31, %v1377_v29 }
 0x725   :  { %v1497_v35 = vadd.f32 %v1485_v51, %v1437_v33 }
 0x727   :  { %v1500_v39 = vpack.c.bf16 %v1497_v35, %v1496_v34 }
 0x729   :  { %1506 = vmatpush.bf16.msra.mxu3 %v1500_v39 }
 0x72a   :  { %v1417_v44 = vpop.permute.xlu1 %1416 }
 0x72b   :  { %v1433_v2 = vadd.f32 %v1417_v44, %v1373_v36 }
 0x72d   :  { %v1493_v55 = vadd.f32 %v1477_v50, %v1433_v2  ;;  %1507 = vmatpush.bf16.msra.mxu3 %v1499_v27 }
 0x72f   :  { %v1498_v56 = vpack.c.bf16 %v1493_v55, %v1492_v53 }
 0x731   :  { %1508 = vmatpush.bf16.msra.mxu3 %v1498_v56 }
 0x734   :  { %1783 = vmatmul.msk.bf16.vlgmr.msra.gmra.mxu3 %vm601_vm4, %v2279_v38 }
 0x735   :  { %1547 = vmatpush.msrb.mxu3 %v1524_v43 }
 0x737   :  { %1548 = vmatpush.msrb.mxu3 %v1523_v47 }
 0x739   :  { %1549 = vmatpush.msrb.mxu3 %v1522_v7 }
 0x73b   :  { %1550 = vmatpush.msrb.mxu3 %v1521_v57 }
 0x73d   :  { %1802 = vmatpush.msra.mxu3 %v1561_v10 }
 0x7b7   :  { %v1510_v38 = vpop.f32.mrf.mxu3 }
 0x7b8   :  { %v1515_v54 = vmul.f32 %v1510_v38, %v2304_v37  ;;  %v1560_v37 = vld [vmem:[%s2549_s19] sm:$0xff] }
 0x7b9   :  { %1587 = vmatpush.msra.mxu0 %v1560_v37  ;;  %1803 = vmatpush.msra.mxu3 %v1560_v37 }
 0x7ba   :  { %v1517_v3 = vmax.f32 %v1515_v54, 0.0 }
 0x7bc   :  { %v1519_v8 = vadd.f32 %v1517_v3, %v2425_v49 }
 0x7be   :  { %1784 = vmatmul.msk.f32.vlgmr.msrb.gmra.mxu3 %vm374_vm3, %v1519_v8 }
 0x7bf   :  { %v1512_v4 = vpop.f32.mrf.mxu3 }
 0x7c0   :  { %v1516_v58 = vmul.f32 %v1512_v4, %v2308_v45  ;;  %v1857_v45 = vld [vmem:[%s2548_s18] ss:$0 sm:$0xff] }
 0x7c2   :  { %v1518_v59 = vmax.f32 %v1516_v58, 0.0 }
 0x7c4   :  { %v1520_v42 = vadd.f32 %v1518_v59, %v2428_v1 }
 0x7c6   :  { %1785 = vmatmul.msk.f32.gmra.mxu3 %vm374_vm3, %v1520_v42 }
 0x841   :  { %v1552_v49 = vpop.f32.mrf.mxu3 }
 0x842   :  { %v1553_v1 = vadd.f32 %v1857_v45, %v1552_v49 }
 0x844   :  { %v1558_v48 = vmax.f32 %v1553_v1, 0.0 }
 0x846   :  { %1786 = vmatmul.msk.f32.vlgmr.msra.gmra.mxu0 %vm325_vm2, %v1558_v48 }
 0x849   :  { %v1555_v6 = vpop.f32.mrf.mxu3 }
 0x84a   :  { %v1556_v61 = vadd.f32 %v1857_v45, %v1555_v6 }
 0x84c   :  { %v1559_v11 = vmax.f32 %v1556_v61, 0.0 }
 0x84e   :  { %1787 = vmatmul.msk.f32.vlgmr.msra.gmra.mxu3 %vm325_vm2, %v1559_v11 }
 0x8c3   :  { %v1589_v14 = vpop.f32.mrf.mxu0 }
 0x8c4   :  { %v1590_v0 = vadd.f32 %v1858_v63, %v1589_v14 }
 0x8c6   :  { %v1595_v5 = vmax.f32 %v1590_v0, 0.0 }
 0x8c8   :  { %1788 = vmatmul.msk.f32.vlgmr.msra.gmra.mxu2 %vm1602_vm5, %v1595_v5 }
 0x8d1   :  { %v1592_v13 = vpop.f32.mrf.mxu3 }
 0x8d2   :  { %v1593_v60 = vadd.f32 %v1858_v63, %v1592_v13 }
 0x8d4   :  { %v1596_v9 = vmax.f32 %v1593_v60, 0.0 }
 0x8d6   :  { %1789 = vmatmul.msk.f32.gmra.mxu2 %vm1602_vm5, %v1596_v9 }
 0x94b   :  { %v1626_v15 = vpop.f32.mrf.mxu2 }
 0x94c   :  { %v1627_v16 = vadd.f32 %v1859_v40, %v1626_v15 }
 0x94e   :  { %1632 = vst [vmem:[#allocation2] sm:$0xff] %v1627_v16 }
 0x959   :  { %v1629_v17 = vpop.f32.mrf.mxu2 }
 0x95a   :  { %v1630_v18 = vadd.f32 %v1859_v40, %v1629_v17 }
 0x95c   :  { %1633 = vst [vmem:[#allocation2 + $0x8] sm:$0xff] %v1630_v18 }
 0x95d   :  { %1646 = dma.vmem_to_hbm [thread:$0]  %s1639_s6, 256, %s1641_s28, [#allocation3], %s1967_s4, %s1967_s4, %s1968_s9  }
 0x95e   :  { %1959 = dma.done.wait [#allocation3], 256  }
 0x95f   :  { %1960 = vsyncadd [#allocation3], 4294967040 }
 0x960   :  { %1651 = vsyncpa [#allocation3], 1 }

</bundles_post_ra>
